<compile_context>
chip_gen: v6e
topology: v6e:2x2x1
jax: 0.10.0
libtpu: 0.0.40
codegen_flags: <defaults>
</compile_context>

<pallas_src>
import math

import jax
import jax.numpy as jnp
from jax.experimental import pallas as pl
from jax.experimental.pallas import tpu as pltpu

_NEG_INF = -1e30  # bias for padded class columns -> exp underflows to 0


def _round_up(a, b):
    return ((a + b - 1) // b) * b


def _choose_tile(n, tm_max):
    """Pick a batch tile: multiple of 8, balanced tiles (no mostly-padding tail),
    and >=2 grid steps for n >= 16 so v7x dual-TC gets work on both cores."""
    if n <= 8:
        return 8
    min_steps = 2 if n >= 16 else 1
    steps = max(min_steps, math.ceil(n / tm_max))
    return _round_up(math.ceil(n / steps), 8)


def _mlp_kernel(x_ref, w1_ref, b1_ref, w2_ref, b2_ref, w3_ref, b3_ref,
                logits_ref, scores_ref):
    # x / weights are bf16; accumulate and do all elementwise math in f32.
    x = x_ref[...]                                                    # (TM, Dp) bf16
    h1 = jnp.dot(x, w1_ref[...], preferred_element_type=jnp.float32) + b1_ref[...]
    h1 = jnp.maximum(h1, 0.0).astype(jnp.bfloat16)                    # ReLU -> bf16 operand
    h2 = jnp.dot(h1, w2_ref[...], preferred_element_type=jnp.float32) + b2_ref[...]
    h2 = jnp.maximum(h2, 0.0).astype(jnp.bfloat16)                    # ReLU -> bf16 operand
    s = jnp.dot(h2, w3_ref[...], preferred_element_type=jnp.float32) + b3_ref[...]
    scores_ref[...] = s.astype(scores_ref.dtype)                      # bf16 writeback
    # numerically stable, exact softmax over the class axis; padded classes
    # have s = -1e30 so exp(s - m) == 0 and they do not perturb the sum.
    m = jnp.max(s, axis=-1, keepdims=True)
    e = jnp.exp(s - m)
    denom = jnp.sum(e, axis=-1, keepdims=True)
    logits_ref[...] = e / denom                                       # rows sum to 1 exactly


def prepare_params(params):
    """One-time padding + bf16 cast of the weights (hoisted out of the per-call
    path). Input params are (in, out)-layout f32; returns padded device arrays."""
    w1, b1, w2, b2, w3, b3 = params
    d, h1_dim = w1.shape            # (D, 512)
    h2_dim = w2.shape[1]            # 64
    n_classes = w3.shape[1]

    d_pad = _round_up(d, 128)
    h1_pad = _round_up(h1_dim, 128)
    h2_pad = _round_up(h2_dim, 128)
    nc_pad = _round_up(n_classes, 128)

    w1p = jnp.zeros((d_pad, h1_pad), jnp.bfloat16).at[:d, :h1_dim].set(w1.astype(jnp.bfloat16))
    b1p = jnp.zeros((1, h1_pad), jnp.float32).at[:, :h1_dim].set(b1.reshape(1, -1))
    w2p = jnp.zeros((h1_pad, h2_pad), jnp.bfloat16).at[:h1_dim, :h2_dim].set(w2.astype(jnp.bfloat16))
    b2p = jnp.zeros((1, h2_pad), jnp.float32).at[:, :h2_dim].set(b2.reshape(1, -1))
    w3p = jnp.zeros((h2_pad, nc_pad), jnp.bfloat16).at[:h2_dim, :n_classes].set(w3.astype(jnp.bfloat16))
    # very negative bias on padded classes so softmax ignores them
    b3p = jnp.full((1, nc_pad), _NEG_INF, jnp.float32).at[:, :n_classes].set(b3.reshape(1, -1))
    return (w1p, b1p, w2p, b2p, w3p, b3p)


def three_layer_nn_forward(images, prepped_params, *, n_classes, tm=512):
    """images: (N, C, H, W) float32. prepped_params: output of prepare_params.
    Returns (softmax logits, unnormalised scores), each (N, n_classes) f32."""
    w1p, b1p, w2p, b2p, w3p, b3p = prepped_params
    n = images.shape[0]
    d_pad, h1_pad = w1p.shape
    h2_pad = w2p.shape[1]
    nc_pad = w3p.shape[1]

    # Single fused reshape + bf16 cast (no f32 intermediate pass over x).
    x = images.reshape(n, -1).astype(jnp.bfloat16)
    d = x.shape[1]
    assert d <= d_pad

    tile = _choose_tile(n, tm)
    n_pad = _round_up(n, tile)

    pad_rows = n_pad - n
    pad_cols = d_pad - d
    if pad_rows or pad_cols:                         # d=1024: pad_cols == 0
        x = jnp.pad(x, ((0, pad_rows), (0, pad_cols)))

    grid = (n_pad // tile,)

    logits_p, scores_p = pl.pallas_call(
        _mlp_kernel,
        out_shape=(
            jax.ShapeDtypeStruct((n_pad, nc_pad), jnp.float32),   # logits
            jax.ShapeDtypeStruct((n_pad, nc_pad), jnp.bfloat16),  # scores (half writeback)
        ),
        grid=grid,
        in_specs=[
            pl.BlockSpec((tile, d_pad), lambda i: (i, 0)),        # x tile (streamed)
            pl.BlockSpec((d_pad, h1_pad), lambda i: (0, 0)),      # W1 (VMEM-resident)
            pl.BlockSpec((1, h1_pad), lambda i: (0, 0)),          # b1
            pl.BlockSpec((h1_pad, h2_pad), lambda i: (0, 0)),     # W2
            pl.BlockSpec((1, h2_pad), lambda i: (0, 0)),          # b2
            pl.BlockSpec((h2_pad, nc_pad), lambda i: (0, 0)),     # W3
            pl.BlockSpec((1, nc_pad), lambda i: (0, 0)),          # b3
        ],
        out_specs=(
            pl.BlockSpec((tile, nc_pad), lambda i: (i, 0)),       # logits (lane-dense)
            pl.BlockSpec((tile, nc_pad), lambda i: (i, 0)),       # scores (lane-dense)
        ),
        compiler_params=pltpu.CompilerParams(
            dimension_semantics=("parallel",),                    # split batch across v7x TCs
            vmem_limit_bytes=32 << 20,
        ),
    )(x, w1p, b1p, w2p, b2p, w3p, b3p)

    # slice padded rows / padded class columns back off; scores back to f32
    logits = logits_p[:n, :n_classes]
    scores = scores_p[:n, :n_classes].astype(jnp.float32)
    return logits, scores


def init_params(key, im_size, n_classes):
    """Deterministic synthetic parameters, shapes matching the nn.Module
    (stored transposed: (in, out))."""
    c, h, w = im_size
    d = c * h * w
    dims = [(d, 512), (512, 64), (64, n_classes)]
    params = []
    for i, (din, dout) in enumerate(dims):
        kw, kb, key = jax.random.split(jax.random.fold_in(key, i), 3)
        scale = 1.0 / jnp.sqrt(jnp.float32(din))
        w_ = jax.random.uniform(kw, (din, dout), jnp.float32, -scale, scale)
        b_ = jax.random.uniform(kb, (1, dout), jnp.float32, -scale, scale)
        params += [w_, b_]
    return tuple(params)


if __name__ == "__main__":
    key = jax.random.PRNGKey(0)
    im_size = (4, 16, 16)        # (C, H, W) -> flattened dim = 1024
    n_classes = 10
    batch = 2

    params = init_params(key, im_size, n_classes)
    prepped = prepare_params(params)          # one-time pad + bf16 cast (outside jit)

    x_key = jax.random.fold_in(key, 123)
    images = jax.random.normal(x_key, (batch,) + im_size, jnp.float32)

    fwd = jax.jit(three_layer_nn_forward, static_argnames=("n_classes", "tm"))
    logits, scores = fwd(images, prepped, n_classes=n_classes)
    jax.block_until_ready((logits, scores))

    # pure-f32 JAX reference; kernel uses bf16 matmul operands and a bf16
    # scores writeback, so compare with correspondingly relaxed tolerances.
    w1, b1, w2, b2, w3, b3 = params
    xf = images.reshape(batch, -1)
    h1 = jnp.maximum(xf @ w1 + b1, 0.0)
    h2 = jnp.maximum(h1 @ w2 + b2, 0.0)
    s_ref = h2 @ w3 + b3
    l_ref = jax.nn.softmax(s_ref, axis=1)

    assert logits.shape == (batch, n_classes)
    assert scores.shape == (batch, n_classes)
    assert jnp.allclose(scores, s_ref, atol=5e-2, rtol=5e-2)
    assert jnp.allclose(logits, l_ref, atol=2e-2, rtol=2e-2)
    assert jnp.allclose(jnp.sum(logits, axis=1), 1.0, atol=1e-3)

    print("KERNEL_OK")
</pallas_src>

<mosaic_0001>
module attributes {stable_mosaic.version = 11 : i64} {
  func.func @_mlp_kernel(%arg0: i32, %arg1: memref<8x1024xbf16, #tpu.memory_space<vmem>>, %arg2: memref<1024x512xbf16, #tpu.memory_space<vmem>>, %arg3: memref<1x512xf32, #tpu.memory_space<vmem>>, %arg4: memref<512x128xbf16, #tpu.memory_space<vmem>>, %arg5: memref<1x128xf32, #tpu.memory_space<vmem>>, %arg6: memref<128x128xbf16, #tpu.memory_space<vmem>>, %arg7: memref<1x128xf32, #tpu.memory_space<vmem>>, %arg8: memref<8x128xf32, #tpu.memory_space<vmem>>, %arg9: memref<8x128xbf16, #tpu.memory_space<vmem>>) attributes {dimension_semantics = [#tpu.dimension_semantics<parallel>], iteration_bounds = array<i64: 1>, scalar_prefetch = 0 : i64, scratch_operands = 0 : i64, tpu.core_type = #tpu.core_type<tc>, window_params = [{transform_indices = @transform_0, window_bounds = array<i64: 8, 1024>}, {pipeline_mode = #tpu.pipeline_mode<synchronous>, transform_indices = @transform_1, window_bounds = array<i64: 1024, 512>}, {pipeline_mode = #tpu.pipeline_mode<synchronous>, transform_indices = @transform_2, window_bounds = array<i64: 1, 512>}, {pipeline_mode = #tpu.pipeline_mode<synchronous>, transform_indices = @transform_3, window_bounds = array<i64: 512, 128>}, {pipeline_mode = #tpu.pipeline_mode<synchronous>, transform_indices = @transform_4, window_bounds = array<i64: 1, 128>}, {pipeline_mode = #tpu.pipeline_mode<synchronous>, transform_indices = @transform_5, window_bounds = array<i64: 128, 128>}, {pipeline_mode = #tpu.pipeline_mode<synchronous>, transform_indices = @transform_6, window_bounds = array<i64: 1, 128>}, {transform_indices = @transform_7, window_bounds = array<i64: 8, 128>}, {transform_indices = @transform_8, window_bounds = array<i64: 8, 128>}]} {
    %c0 = arith.constant 0 : index
    %c0_0 = arith.constant 0 : index
    %0 = vector.load %arg1[%c0, %c0_0] : memref<8x1024xbf16, #tpu.memory_space<vmem>>, vector<8x1024xbf16>
    %c0_1 = arith.constant 0 : index
    %c0_2 = arith.constant 0 : index
    %1 = vector.load %arg2[%c0_1, %c0_2] : memref<1024x512xbf16, #tpu.memory_space<vmem>>, vector<1024x512xbf16>
    %cst = arith.constant dense<0.000000e+00> : vector<8x512xf32>
    %2 = tpu.matmul %0, %1, %cst {dimension_numbers = #tpu.dot_dimension_numbers<[1], [0], [0], [1], [0, 0, 1, 1], [], []>} : vector<8x1024xbf16>, vector<1024x512xbf16>, vector<8x512xf32> -> vector<8x512xf32>
    %c0_3 = arith.constant 0 : index
    %c0_4 = arith.constant 0 : index
    %3 = vector.load %arg3[%c0_3, %c0_4] : memref<1x512xf32, #tpu.memory_space<vmem>>, vector<1x512xf32>
    %4 = vector.broadcast %3 : vector<1x512xf32> to vector<8x512xf32>
    %5 = arith.addf %2, %4 : vector<8x512xf32>
    %cst_5 = arith.constant 0.000000e+00 : f32
    %6 = vector.broadcast %cst_5 : f32 to vector<8x512xf32>
    %7 = arith.maximumf %5, %6 : vector<8x512xf32>
    %8 = arith.truncf %7 : vector<8x512xf32> to vector<8x512xbf16>
    %c0_6 = arith.constant 0 : index
    %c0_7 = arith.constant 0 : index
    %9 = vector.load %arg4[%c0_6, %c0_7] : memref<512x128xbf16, #tpu.memory_space<vmem>>, vector<512x128xbf16>
    %cst_8 = arith.constant dense<0.000000e+00> : vector<8x128xf32>
    %10 = tpu.matmul %8, %9, %cst_8 {dimension_numbers = #tpu.dot_dimension_numbers<[1], [0], [0], [1], [0, 0, 1, 1], [], []>} : vector<8x512xbf16>, vector<512x128xbf16>, vector<8x128xf32> -> vector<8x128xf32>
    %c0_9 = arith.constant 0 : index
    %c0_10 = arith.constant 0 : index
    %11 = vector.load %arg5[%c0_9, %c0_10] : memref<1x128xf32, #tpu.memory_space<vmem>>, vector<1x128xf32>
    %12 = vector.broadcast %11 : vector<1x128xf32> to vector<8x128xf32>
    %13 = arith.addf %10, %12 : vector<8x128xf32>
    %cst_11 = arith.constant 0.000000e+00 : f32
    %14 = vector.broadcast %cst_11 : f32 to vector<8x128xf32>
    %15 = arith.maximumf %13, %14 : vector<8x128xf32>
    %16 = arith.truncf %15 : vector<8x128xf32> to vector<8x128xbf16>
    %c0_12 = arith.constant 0 : index
    %c0_13 = arith.constant 0 : index
    %17 = vector.load %arg6[%c0_12, %c0_13] : memref<128x128xbf16, #tpu.memory_space<vmem>>, vector<128x128xbf16>
    %cst_14 = arith.constant dense<0.000000e+00> : vector<8x128xf32>
    %18 = tpu.matmul %16, %17, %cst_14 {dimension_numbers = #tpu.dot_dimension_numbers<[1], [0], [0], [1], [0, 0, 1, 1], [], []>} : vector<8x128xbf16>, vector<128x128xbf16>, vector<8x128xf32> -> vector<8x128xf32>
    %c0_15 = arith.constant 0 : index
    %c0_16 = arith.constant 0 : index
    %19 = vector.load %arg7[%c0_15, %c0_16] : memref<1x128xf32, #tpu.memory_space<vmem>>, vector<1x128xf32>
    %20 = vector.broadcast %19 : vector<1x128xf32> to vector<8x128xf32>
    %21 = arith.addf %18, %20 : vector<8x128xf32>
    %22 = arith.truncf %21 : vector<8x128xf32> to vector<8x128xbf16>
    %c0_17 = arith.constant 0 : index
    %c0_18 = arith.constant 0 : index
    %23 = vector.load %arg9[%c0_17, %c0_18] : memref<8x128xbf16, #tpu.memory_space<vmem>>, vector<8x128xbf16>
    tpu.vector_store %arg9[%c0_17, %c0_18], %22 {strides = array<i32>} : memref<8x128xbf16, #tpu.memory_space<vmem>>, vector<8x128xbf16>,
    %cst_19 = arith.constant dense<0xFF800000> : vector<8xf32>
    %24 = vector.multi_reduction <maximumf>, %21, %cst_19 [1] : vector<8x128xf32> to vector<8xf32>
    %25 = vector.shape_cast %24 : vector<8xf32> to vector<8x1xf32>
    %26 = vector.broadcast %25 : vector<8x1xf32> to vector<8x128xf32>
    %27 = arith.subf %21, %26 : vector<8x128xf32>
    %28 = math.exp %27 : vector<8x128xf32>
    %cst_20 = arith.constant dense<0.000000e+00> : vector<8xf32>
    %29 = vector.multi_reduction <add>, %28, %cst_20 [1] : vector<8x128xf32> to vector<8xf32>
    %30 = vector.shape_cast %29 : vector<8xf32> to vector<8x1xf32>
    %31 = vector.broadcast %30 : vector<8x1xf32> to vector<8x128xf32>
    %32 = arith.divf %28, %31 : vector<8x128xf32>
    %c0_21 = arith.constant 0 : index
    %c0_22 = arith.constant 0 : index
    %33 = vector.load %arg8[%c0_21, %c0_22] : memref<8x128xf32, #tpu.memory_space<vmem>>, vector<8x128xf32>
    tpu.vector_store %arg8[%c0_21, %c0_22], %32 {strides = array<i32>} : memref<8x128xf32, #tpu.memory_space<vmem>>, vector<8x128xf32>,
    return
  }
  func.func @transform_0(%arg0: i32) -> (i32, i32) {
    %c0_i32 = arith.constant 0 : i32
    %c0_i32_0 = arith.constant 0 : i32
    return %arg0, %c0_i32 : i32, i32
  }
  func.func @transform_1(%arg0: i32) -> (i32, i32) {
    %c0_i32 = arith.constant 0 : i32
    %c0_i32_0 = arith.constant 0 : i32
    %c0_i32_1 = arith.constant 0 : i32
    return %c0_i32, %c0_i32_0 : i32, i32
  }
  func.func @transform_2(%arg0: i32) -> (i32, i32) {
    %c0_i32 = arith.constant 0 : i32
    %c0_i32_0 = arith.constant 0 : i32
    %c0_i32_1 = arith.constant 0 : i32
    return %c0_i32, %c0_i32_0 : i32, i32
  }
  func.func @transform_3(%arg0: i32) -> (i32, i32) {
    %c0_i32 = arith.constant 0 : i32
    %c0_i32_0 = arith.constant 0 : i32
    %c0_i32_1 = arith.constant 0 : i32
    return %c0_i32, %c0_i32_0 : i32, i32
  }
  func.func @transform_4(%arg0: i32) -> (i32, i32) {
    %c0_i32 = arith.constant 0 : i32
    %c0_i32_0 = arith.constant 0 : i32
    %c0_i32_1 = arith.constant 0 : i32
    return %c0_i32, %c0_i32_0 : i32, i32
  }
  func.func @transform_5(%arg0: i32) -> (i32, i32) {
    %c0_i32 = arith.constant 0 : i32
    %c0_i32_0 = arith.constant 0 : i32
    %c0_i32_1 = arith.constant 0 : i32
    return %c0_i32, %c0_i32_0 : i32, i32
  }
  func.func @transform_6(%arg0: i32) -> (i32, i32) {
    %c0_i32 = arith.constant 0 : i32
    %c0_i32_0 = arith.constant 0 : i32
    %c0_i32_1 = arith.constant 0 : i32
    return %c0_i32, %c0_i32_0 : i32, i32
  }
  func.func @transform_7(%arg0: i32) -> (i32, i32) {
    %c0_i32 = arith.constant 0 : i32
    %c0_i32_0 = arith.constant 0 : i32
    return %arg0, %c0_i32 : i32, i32
  }
  func.func @transform_8(%arg0: i32) -> (i32, i32) {
    %c0_i32 = arith.constant 0 : i32
    %c0_i32_0 = arith.constant 0 : i32
    return %arg0, %c0_i32 : i32, i32
  }
}

</mosaic_0001>

<bundles_post_ra>
// kernel: three_layer_nn_forward.1
= control target key start
LH: loop header
LB: loop body
LE: loop exit
PB: predicated region body
PF: predicated region fallthrough
CT: control target
= control target key end

     0   :  { %14 = vsyncpa [#allocation3], 0  ;;  %s3575_s0 = inlined_call_operand.vmem [shape: bf16[8,1024], index: 0, kind: input, shape index: {}]   ;;  %s3576_s1 = inlined_call_operand.hbm [shape: bf16[1024,512], index: 1, kind: input, shape index: {}]   ;;  %s3577_s2 = inlined_call_operand.vmem [shape: f32[1,512], index: 2, kind: input, shape index: {}]   ;;  %s3578_s3 = inlined_call_operand.vmem [shape: bf16[512,128], index: 3, kind: input, shape index: {}]   ;;  %s3579_s4 = inlined_call_operand.vmem [shape: f32[1,128], index: 4, kind: input, shape index: {}]   ;;  %s3580_s5 = inlined_call_operand.hbm [shape: bf16[128,128], index: 5, kind: input, shape index: {}]   ;;  %s3581_s6 = inlined_call_operand.vmem [shape: f32[1,128], index: 6, kind: input, shape index: {}]   ;;  %s3582_s7 = inlined_call_operand.vmem [shape: f32[8,128], index: 7, kind: output, shape index: {0}]   ;;  %s3583_s8 = inlined_call_operand.vmem [shape: bf16[8,128], index: 8, kind: output, shape index: {1}]  }
   0x1   :  { %15 = vsyncpa [#allocation5], 0  ;;  %s3328_s27 = smov [#allocation2]  }
   0x2   :  { %s23_s28 = sshll.u32 %s3328_s27, 4  ;;  %s24_s28 = int_to_ptr.vmem [resolvable:$true] %s23_s28 }
   0x3   :  { %s3292_s29 = scalar_lea.vmem %s24_s28, 32768  ;;  %p3297_p1 = scmp.lt.s32.totalorder %s24_s28, %s24_s28 }
   0x4   :  { %p3293_p0 = scmp.ne.s32.totalorder %s24_s28, %s3292_s29  ;;  %p3298_p2 = scmp.lt.s32.totalorder %s3292_s29, %s3292_s29 }
   0x6   :  { %p3299_p3 = por %p3298_p2, %p3297_p1 }
   0x8   :  { %p3300_p4 = pnand %p3299_p3, %p3293_p0 }
   0xa   :  { %3303 = shalt.err (!%p3300_p4)
}
   0xb   :  { %s3329_s30 = smov 256   ;;  %s3330_s9 = smov 16  }
   0xc   :  { %29 = dma.hbm_to_vmem [thread:$0]  %s3576_s1, 32768, %s24_s28, [#allocation3], %s3329_s30, %s3329_s30, %s3330_s9  }
   0xd   :  { %s3331_s12 = smov [#allocation4]  }
   0xe   :  { %s41_s13 = sshll.u32 %s3331_s12, 4  ;;  %s42_s13 = int_to_ptr.vmem [resolvable:$true] %s41_s13 }
   0xf   :  { %s3312_s14 = scalar_lea.vmem %s42_s13, 1024  ;;  %p3317_p6 = scmp.lt.s32.totalorder %s42_s13, %s42_s13 }
  0x10   :  { %p3313_p5 = scmp.ne.s32.totalorder %s42_s13, %s3312_s14  ;;  %p3318_p7 = scmp.lt.s32.totalorder %s3312_s14, %s3312_s14 }
  0x12   :  { %p3319_p8 = por %p3318_p7, %p3317_p6 }
  0x14   :  { %p3320_p9 = pnand %p3319_p8, %p3313_p5 }
  0x16   :  { %3323 = shalt.err (!%p3320_p9)
}
  0x17   :  { %s3332_s15 = smov 64   ;;  %s3333_s16 = smov 4  }
  0x18   :  { %47 = dma.hbm_to_vmem [thread:$0]  %s3580_s5, 1024, %s42_s13, [#allocation5], %s3332_s15, %s3332_s15, %s3333_s16  }
  0x19   :  { %3324 = dma.done.wait [#allocation3], 32768  }
  0x1a   :  { %3325 = vsyncadd [#allocation3], 4294934528 }
  0x1b   :  { %3326 = dma.done.wait [#allocation5], 1024  }
  0x1c   :  { %3327 = vsyncadd [#allocation5], 4294966272  ;;  %v2848_v0 = vld [vmem:[#allocation2 + $0xe4] ss:$16 sps:$4 sm:$0xff]   ;;  %v2852_v2 = vld [vmem:[#allocation2 + $0xe0] ss:$16 sps:$4 sm:$0xff]  }
  0x1d   :  { %v2850_v1 = vld [vmem:[#allocation2 + $0x2e4] ss:$16 sps:$4 sm:$0xff]   ;;  %1647 = vmatprep.subr.bf16.mxu0 %v2848_v0  ;;  %v2853_v3 = vld [vmem:[#allocation2 + $0x2e0] ss:$16 sps:$4 sm:$0xff]   ;;  %v58_v48 = vld [vmem:[%s3575_s0 + $0x8] sm:$0xff]  ;;  %vm3335_vm0 = vmmov 0  }
  0x1e   :  { %1688 = vmatprep.subr.bf16.mxu1 %v2850_v1  ;;  %v2854_v4 = vld [vmem:[#allocation2 + $0xc4] ss:$16 sps:$4 sm:$0xff]   ;;  %1648 = vmatpush1.bf16.msra.mxu0 %v2852_v2  ;;  %v2858_v6 = vld [vmem:[#allocation2 + $0xc0] ss:$16 sps:$4 sm:$0xff]   ;;  %v3395_v51 = vcombine.high %v58_v48, %v58_v48 }
  0x1f   :  { %1689 = vmatpush1.bf16.msra.mxu1 %v2853_v3  ;;  %v2856_v5 = vld [vmem:[#allocation2 + $0x2c4] ss:$16 sps:$4 sm:$0xff]   ;;  %1649 = vmatprep.subr.bf16.mxu0 %v2854_v4  ;;  %v2859_v7 = vld [vmem:[#allocation2 + $0x2c0] ss:$16 sps:$4 sm:$0xff]  }
  0x20   :  { %1690 = vmatprep.subr.bf16.mxu1 %v2856_v5  ;;  %v2860_v8 = vld [vmem:[#allocation2 + $0xa4] ss:$16 sps:$4 sm:$0xff]   ;;  %v2864_v10 = vld [vmem:[#allocation2 + $0xa0] ss:$16 sps:$4 sm:$0xff]   ;;  %1720 = vmatprep.mubr.bf16.mxu1 %v3395_v51 }
  0x21   :  { %v2862_v9 = vld [vmem:[#allocation2 + $0x2a4] ss:$16 sps:$4 sm:$0xff]   ;;  %v2865_v11 = vld [vmem:[#allocation2 + $0x2a0] ss:$16 sps:$4 sm:$0xff]  }
  0x22   :  { %1650 = vmatpush1.bf16.msra.mxu0 %v2858_v6  ;;  %v2866_v12 = vld [vmem:[#allocation2 + $0x84] ss:$16 sps:$4 sm:$0xff]   ;;  %v2870_v14 = vld [vmem:[#allocation2 + $0x80] ss:$16 sps:$4 sm:$0xff]  }
  0x23   :  { %1691 = vmatpush1.bf16.msra.mxu1 %v2859_v7  ;;  %1651 = vmatprep.subr.bf16.mxu0 %v2860_v8  ;;  %v2868_v13 = vld [vmem:[#allocation2 + $0x284] ss:$16 sps:$4 sm:$0xff]   ;;  %v2871_v15 = vld [vmem:[#allocation2 + $0x280] ss:$16 sps:$4 sm:$0xff]   ;;  %v3401_v7 = vcombine.low %v58_v48, %v58_v48 }
  0x24   :  { %1692 = vmatprep.subr.bf16.mxu1 %v2862_v9  ;;  %v2872_v16 = vld [vmem:[#allocation2 + $0x64] ss:$16 sps:$4 sm:$0xff]   ;;  %v2876_v18 = vld [vmem:[#allocation2 + $0x60] ss:$16 sps:$4 sm:$0xff]  }
  0x25   :  { %v2874_v17 = vld [vmem:[#allocation2 + $0x264] ss:$16 sps:$4 sm:$0xff]   ;;  %v2877_v19 = vld [vmem:[#allocation2 + $0x260] ss:$16 sps:$4 sm:$0xff]  }
  0x26   :  { %1652 = vmatpush1.bf16.msra.mxu0 %v2864_v10  ;;  %v2878_v20 = vld [vmem:[#allocation2 + $0x44] ss:$16 sps:$4 sm:$0xff]   ;;  %v2882_v22 = vld [vmem:[#allocation2 + $0x40] ss:$16 sps:$4 sm:$0xff]  }
  0x27   :  { %1693 = vmatpush1.bf16.msra.mxu1 %v2865_v11  ;;  %1653 = vmatprep.subr.bf16.mxu0 %v2866_v12  ;;  %v2880_v21 = vld [vmem:[#allocation2 + $0x244] ss:$16 sps:$4 sm:$0xff]   ;;  %v2883_v23 = vld [vmem:[#allocation2 + $0x240] ss:$16 sps:$4 sm:$0xff]  }
  0x28   :  { %1694 = vmatprep.subr.bf16.mxu1 %v2868_v13  ;;  %v2884_v24 = vld [vmem:[#allocation2 + $0x24] ss:$16 sps:$4 sm:$0xff]   ;;  %v2888_v26 = vld [vmem:[#allocation2 + $0x20] ss:$16 sps:$4 sm:$0xff]  }
  0x29   :  { %v2886_v25 = vld [vmem:[#allocation2 + $0x224] ss:$16 sps:$4 sm:$0xff]   ;;  %v2889_v27 = vld [vmem:[#allocation2 + $0x220] ss:$16 sps:$4 sm:$0xff]  }
  0x2a   :  { %1654 = vmatpush1.bf16.msra.mxu0 %v2870_v14  ;;  %v2890_v28 = vld [vmem:[#allocation2 + $0x4] ss:$16 sps:$4 sm:$0xff]   ;;  %v2894_v30 = vld [vmem:[#allocation2] ss:$16 sps:$4 sm:$0xff]  }
  0x2b   :  { %1695 = vmatpush1.bf16.msra.mxu1 %v2871_v15  ;;  %1655 = vmatprep.subr.bf16.mxu0 %v2872_v16  ;;  %v2892_v29 = vld [vmem:[#allocation2 + $0x204] ss:$16 sps:$4 sm:$0xff]   ;;  %v2895_v31 = vld [vmem:[#allocation2 + $0x200] ss:$16 sps:$4 sm:$0xff]  }
  0x2c   :  { %1696 = vmatprep.subr.bf16.mxu1 %v2874_v17  ;;  %v2896_v32 = vld [vmem:[#allocation2 + $0x1e4] ss:$16 sps:$4 sm:$0xff]   ;;  %v2900_v34 = vld [vmem:[#allocation2 + $0x1e0] ss:$16 sps:$4 sm:$0xff]  }
  0x2d   :  { %v2898_v33 = vld [vmem:[#allocation2 + $0x3e4] ss:$16 sps:$4 sm:$0xff]   ;;  %v2901_v35 = vld [vmem:[#allocation2 + $0x3e0] ss:$16 sps:$4 sm:$0xff]  }
  0x2e   :  { %1656 = vmatpush1.bf16.msra.mxu0 %v2876_v18  ;;  %v2902_v36 = vld [vmem:[#allocation2 + $0x1c4] ss:$16 sps:$4 sm:$0xff]   ;;  %v2906_v38 = vld [vmem:[#allocation2 + $0x1c0] ss:$16 sps:$4 sm:$0xff]  }
  0x2f   :  { %1697 = vmatpush1.bf16.msra.mxu1 %v2877_v19  ;;  %1657 = vmatprep.subr.bf16.mxu0 %v2878_v20  ;;  %v2904_v37 = vld [vmem:[#allocation2 + $0x3c4] ss:$16 sps:$4 sm:$0xff]   ;;  %v2907_v39 = vld [vmem:[#allocation2 + $0x3c0] ss:$16 sps:$4 sm:$0xff]  }
  0x30   :  { %1698 = vmatprep.subr.bf16.mxu1 %v2880_v21  ;;  %v2908_v40 = vld [vmem:[#allocation2 + $0x1a4] ss:$16 sps:$4 sm:$0xff]   ;;  %v2912_v42 = vld [vmem:[#allocation2 + $0x1a0] ss:$16 sps:$4 sm:$0xff]  }
  0x31   :  { %v2910_v41 = vld [vmem:[#allocation2 + $0x3a4] ss:$16 sps:$4 sm:$0xff]   ;;  %v2913_v43 = vld [vmem:[#allocation2 + $0x3a0] ss:$16 sps:$4 sm:$0xff]  }
  0x32   :  { %1658 = vmatpush1.bf16.msra.mxu0 %v2882_v22  ;;  %v2914_v44 = vld [vmem:[#allocation2 + $0x184] ss:$16 sps:$4 sm:$0xff]   ;;  %v2918_v49 = vld [vmem:[#allocation2 + $0x180] ss:$16 sps:$4 sm:$0xff]  }
  0x33   :  { %1699 = vmatpush1.bf16.msra.mxu1 %v2883_v23  ;;  %1659 = vmatprep.subr.bf16.mxu0 %v2884_v24  ;;  %v2916_v45 = vld [vmem:[#allocation2 + $0x384] ss:$16 sps:$4 sm:$0xff]   ;;  %v2919_v50 = vld [vmem:[#allocation2 + $0x380] ss:$16 sps:$4 sm:$0xff]  }
  0x34   :  { %1700 = vmatprep.subr.bf16.mxu1 %v2886_v25  ;;  %v57_v46 = vld [vmem:[%s3575_s0] sm:$0xff] }
  0x35   :  { %v3390_v47 = vcombine.high %v57_v46, %v57_v46  ;;  %v2920_v52 = vld [vmem:[#allocation2 + $0x164] ss:$16 sps:$4 sm:$0xff]   ;;  %v2924_v54 = vld [vmem:[#allocation2 + $0x160] ss:$16 sps:$4 sm:$0xff]   ;;  %v3399_v6 = vcombine.low %v57_v46, %v57_v46 }
  0x36   :  { %1660 = vmatpush1.bf16.msra.mxu0 %v2888_v26  ;;  %v2922_v53 = vld [vmem:[#allocation2 + $0x364] ss:$16 sps:$4 sm:$0xff]   ;;  %v2925_v55 = vld [vmem:[#allocation2 + $0x360] ss:$16 sps:$4 sm:$0xff]  }
  0x37   :  { %1701 = vmatpush1.bf16.msra.mxu1 %v2889_v27  ;;  %1661 = vmatprep.subr.bf16.mxu0 %v2890_v28  ;;  %v2926_v56 = vld [vmem:[#allocation2 + $0x144] ss:$16 sps:$4 sm:$0xff]   ;;  %v2930_v58 = vld [vmem:[#allocation2 + $0x140] ss:$16 sps:$4 sm:$0xff]  }
  0x38   :  { %1702 = vmatprep.subr.bf16.mxu1 %v2892_v29  ;;  %1679 = vmatprep.mubr.bf16.mxu0 %v3390_v47  ;;  %v2928_v57 = vld [vmem:[#allocation2 + $0x344] ss:$16 sps:$4 sm:$0xff]   ;;  %v2931_v59 = vld [vmem:[#allocation2 + $0x340] ss:$16 sps:$4 sm:$0xff]  }
  0x39   :  { %v2932_v60 = vld [vmem:[#allocation2 + $0x124] ss:$16 sps:$4 sm:$0xff]   ;;  %v2936_v62 = vld [vmem:[#allocation2 + $0x120] ss:$16 sps:$4 sm:$0xff]  }
  0x3a   :  { %1662 = vmatpush1.bf16.msra.mxu0 %v2894_v30  ;;  %v2934_v61 = vld [vmem:[#allocation2 + $0x324] ss:$16 sps:$4 sm:$0xff]   ;;  %v2937_v63 = vld [vmem:[#allocation2 + $0x320] ss:$16 sps:$4 sm:$0xff]  }
  0x3b   :  { %1703 = vmatpush1.bf16.msra.mxu1 %v2895_v31  ;;  %1663 = vmatprep.subr.bf16.mxu0 %v2896_v32  ;;  %v2938_v0 = vld [vmem:[#allocation2 + $0x104] ss:$16 sps:$4 sm:$0xff]   ;;  %v2942_v2 = vld [vmem:[#allocation2 + $0x100] ss:$16 sps:$4 sm:$0xff]  }
  0x3c   :  { %1704 = vmatprep.subr.bf16.mxu1 %v2898_v33  ;;  %v2940_v1 = vld [vmem:[#allocation2 + $0x304] ss:$16 sps:$4 sm:$0xff]   ;;  %v2943_v3 = vld [vmem:[#allocation2 + $0x300] ss:$16 sps:$4 sm:$0xff]   ;;  %v3413_v33 = vld [vmem:[%s3575_s0 + $0x18] sm:$0xff] }
  0x3d   :  { %v2950_v4 = vld [vmem:[#allocation2 + $0x4e4] ss:$16 sps:$4 sm:$0xff]   ;;  %v2948_v8 = vld [vmem:[#allocation2 + $0x4e0] ss:$16 sps:$4 sm:$0xff]  }
  0x3e   :  { %1664 = vmatpush2.bf16.msra.mxu0 %v2900_v34  ;;  %v2953_v5 = vld [vmem:[#allocation2 + $0x6e4] ss:$16 sps:$4 sm:$0xff]   ;;  %v2951_v9 = vld [vmem:[#allocation2 + $0x6e0] ss:$16 sps:$4 sm:$0xff]  }
  0x3f   :  { %1705 = vmatpush2.bf16.msra.mxu1 %v2901_v35  ;;  %1665 = vmatprep.subr.bf16.mxu0 %v2902_v36  ;;  %v2956_v10 = vld [vmem:[#allocation2 + $0x4c4] ss:$16 sps:$4 sm:$0xff]   ;;  %v2954_v12 = vld [vmem:[#allocation2 + $0x4c0] ss:$16 sps:$4 sm:$0xff]  }
  0x40   :  { %1706 = vmatprep.subr.bf16.mxu1 %v2904_v37  ;;  %v2959_v11 = vld [vmem:[#allocation2 + $0x6c4] ss:$16 sps:$4 sm:$0xff]   ;;  %v2957_v13 = vld [vmem:[#allocation2 + $0x6c0] ss:$16 sps:$4 sm:$0xff]   ;;  %v3421_v37 = vcombine.high %v3413_v33, %v3413_v33 }
  0x41   :  { %v2962_v14 = vld [vmem:[#allocation2 + $0x4a4] ss:$16 sps:$4 sm:$0xff]   ;;  %v2960_v16 = vld [vmem:[#allocation2 + $0x4a0] ss:$16 sps:$4 sm:$0xff]  }
  0x42   :  { %1666 = vmatpush2.bf16.msra.mxu0 %v2906_v38  ;;  %v2965_v15 = vld [vmem:[#allocation2 + $0x6a4] ss:$16 sps:$4 sm:$0xff]   ;;  %v2963_v17 = vld [vmem:[#allocation2 + $0x6a0] ss:$16 sps:$4 sm:$0xff]  }
  0x43   :  { %1707 = vmatpush2.bf16.msra.mxu1 %v2907_v39  ;;  %1667 = vmatprep.subr.bf16.mxu0 %v2908_v40  ;;  %v2968_v18 = vld [vmem:[#allocation2 + $0x484] ss:$16 sps:$4 sm:$0xff]   ;;  %v2966_v20 = vld [vmem:[#allocation2 + $0x480] ss:$16 sps:$4 sm:$0xff]  }
  0x44   :  { %1708 = vmatprep.subr.bf16.mxu1 %v2910_v41  ;;  %v2971_v19 = vld [vmem:[#allocation2 + $0x684] ss:$16 sps:$4 sm:$0xff]   ;;  %v2969_v21 = vld [vmem:[#allocation2 + $0x680] ss:$16 sps:$4 sm:$0xff]  }
  0x45   :  { %v2974_v22 = vld [vmem:[#allocation2 + $0x464] ss:$16 sps:$4 sm:$0xff]   ;;  %v2972_v24 = vld [vmem:[#allocation2 + $0x460] ss:$16 sps:$4 sm:$0xff]  }
  0x46   :  { %1668 = vmatpush2.bf16.msra.mxu0 %v2912_v42  ;;  %v2977_v23 = vld [vmem:[#allocation2 + $0x664] ss:$16 sps:$4 sm:$0xff]   ;;  %v2975_v25 = vld [vmem:[#allocation2 + $0x660] ss:$16 sps:$4 sm:$0xff]  }
  0x47   :  { %1709 = vmatpush2.bf16.msra.mxu1 %v2913_v43  ;;  %1669 = vmatprep.subr.bf16.mxu0 %v2914_v44  ;;  %v2980_v26 = vld [vmem:[#allocation2 + $0x444] ss:$16 sps:$4 sm:$0xff]   ;;  %v2978_v28 = vld [vmem:[#allocation2 + $0x440] ss:$16 sps:$4 sm:$0xff]  }
  0x48   :  { %1710 = vmatprep.subr.bf16.mxu1 %v2916_v45  ;;  %v2983_v27 = vld [vmem:[#allocation2 + $0x644] ss:$16 sps:$4 sm:$0xff]   ;;  %v2981_v29 = vld [vmem:[#allocation2 + $0x640] ss:$16 sps:$4 sm:$0xff]  }
  0x49   :  { %v2986_v30 = vld [vmem:[#allocation2 + $0x424] ss:$16 sps:$4 sm:$0xff]   ;;  %v2984_v34 = vld [vmem:[#allocation2 + $0x420] ss:$16 sps:$4 sm:$0xff]  }
  0x4a   :  { %1670 = vmatpush2.bf16.msra.mxu0 %v2918_v49  ;;  %v2989_v31 = vld [vmem:[#allocation2 + $0x624] ss:$16 sps:$4 sm:$0xff]   ;;  %v2987_v35 = vld [vmem:[#allocation2 + $0x620] ss:$16 sps:$4 sm:$0xff]  }
  0x4b   :  { %1711 = vmatpush2.bf16.msra.mxu1 %v2919_v50  ;;  %1671 = vmatprep.subr.bf16.mxu0 %v2920_v52  ;;  %v3408_v32 = vld [vmem:[%s3575_s0 + $0x10] sm:$0xff] }
  0x4c   :  { %1712 = vmatprep.subr.bf16.mxu1 %v2922_v53  ;;  %v3417_v36 = vcombine.high %v3408_v32, %v3408_v32  ;;  %v2992_v38 = vld [vmem:[#allocation2 + $0x404] ss:$16 sps:$4 sm:$0xff]   ;;  %v2990_v40 = vld [vmem:[#allocation2 + $0x400] ss:$16 sps:$4 sm:$0xff]  }
  0x4d   :  { %v2995_v39 = vld [vmem:[#allocation2 + $0x604] ss:$16 sps:$4 sm:$0xff]   ;;  %v2993_v41 = vld [vmem:[#allocation2 + $0x600] ss:$16 sps:$4 sm:$0xff]  }
  0x4e   :  { %1672 = vmatpush2.bf16.msra.mxu0 %v2924_v54  ;;  %v2998_v42 = vld [vmem:[#allocation2 + $0x5e4] ss:$16 sps:$4 sm:$0xff]   ;;  %v2996_v44 = vld [vmem:[#allocation2 + $0x5e0] ss:$16 sps:$4 sm:$0xff]  }
  0x4f   :  { %1713 = vmatpush2.bf16.msra.mxu1 %v2925_v55  ;;  %1673 = vmatprep.subr.bf16.mxu0 %v2926_v56  ;;  %v3001_v43 = vld [vmem:[#allocation2 + $0x7e4] ss:$16 sps:$4 sm:$0xff]   ;;  %v2999_v45 = vld [vmem:[#allocation2 + $0x7e0] ss:$16 sps:$4 sm:$0xff]  }
  0x50   :  { %1714 = vmatprep.subr.bf16.mxu1 %v2928_v57  ;;  %v3004_v46 = vld [vmem:[#allocation2 + $0x5c4] ss:$16 sps:$4 sm:$0xff]   ;;  %v3002_v49 = vld [vmem:[#allocation2 + $0x5c0] ss:$16 sps:$4 sm:$0xff]  }
  0x51   :  { %v3007_v48 = vld [vmem:[#allocation2 + $0x7c4] ss:$16 sps:$4 sm:$0xff]   ;;  %v3005_v50 = vld [vmem:[#allocation2 + $0x7c0] ss:$16 sps:$4 sm:$0xff]  }
  0x52   :  { %1674 = vmatpush2.bf16.msra.mxu0 %v2930_v58  ;;  %v3010_v52 = vld [vmem:[#allocation2 + $0x5a4] ss:$16 sps:$4 sm:$0xff]   ;;  %v3008_v54 = vld [vmem:[#allocation2 + $0x5a0] ss:$16 sps:$4 sm:$0xff]  }
  0x53   :  { %1715 = vmatpush2.bf16.msra.mxu1 %v2931_v59  ;;  %1675 = vmatprep.subr.bf16.mxu0 %v2932_v60  ;;  %v3013_v53 = vld [vmem:[#allocation2 + $0x7a4] ss:$16 sps:$4 sm:$0xff]   ;;  %v3011_v55 = vld [vmem:[#allocation2 + $0x7a0] ss:$16 sps:$4 sm:$0xff]  }
  0x54   :  { %1716 = vmatprep.subr.bf16.mxu1 %v2934_v61  ;;  %v3016_v56 = vld [vmem:[#allocation2 + $0x584] ss:$16 sps:$4 sm:$0xff]   ;;  %v3014_v58 = vld [vmem:[#allocation2 + $0x580] ss:$16 sps:$4 sm:$0xff]  }
  0x55   :  { %v3019_v57 = vld [vmem:[#allocation2 + $0x784] ss:$16 sps:$4 sm:$0xff]   ;;  %v3017_v59 = vld [vmem:[#allocation2 + $0x780] ss:$16 sps:$4 sm:$0xff]  }
  0x56   :  { %1676 = vmatpush2.bf16.msra.mxu0 %v2936_v62  ;;  %v3022_v60 = vld [vmem:[#allocation2 + $0x564] ss:$16 sps:$4 sm:$0xff]   ;;  %v3020_v62 = vld [vmem:[#allocation2 + $0x560] ss:$16 sps:$4 sm:$0xff]  }
  0x57   :  { %1717 = vmatpush2.bf16.msra.mxu1 %v2937_v63  ;;  %1677 = vmatprep.subr.bf16.mxu0 %v2938_v0  ;;  %v3025_v61 = vld [vmem:[#allocation2 + $0x764] ss:$16 sps:$4 sm:$0xff]   ;;  %v3023_v63 = vld [vmem:[#allocation2 + $0x760] ss:$16 sps:$4 sm:$0xff]  }
  0x58   :  { %1718 = vmatprep.subr.bf16.mxu1 %v2940_v1  ;;  %v3028_v0 = vld [vmem:[#allocation2 + $0x544] ss:$16 sps:$4 sm:$0xff]  }
  0x59   :  { %v3031_v1 = vld [vmem:[#allocation2 + $0x744] ss:$16 sps:$4 sm:$0xff]  }
  0x5a   :  { %1678 = vmatpush2.bf16.msra.mxu0 %v2942_v2  ;;  %v3026_v2 = vld [vmem:[#allocation2 + $0x540] ss:$16 sps:$4 sm:$0xff]  }
  0x5b   :  { %1719 = vmatpush2.bf16.msra.mxu1 %v2943_v3  ;;  %1729 = vmatprep.subr.bf16.mxu0 %v2950_v4  ;;  %v3029_v3 = vld [vmem:[#allocation2 + $0x740] ss:$16 sps:$4 sm:$0xff]   ;;  %v3034_v4 = vld [vmem:[#allocation2 + $0x524] ss:$16 sps:$4 sm:$0xff]  }
  0x5c   :  { %1770 = vmatprep.subr.bf16.mxu1 %v2953_v5  ;;  %v3037_v5 = vld [vmem:[#allocation2 + $0x724] ss:$16 sps:$4 sm:$0xff]  }
  0x5d   :  { %1680 = vmatmul.mubr.bf16.vlgmr.msra.gmra.mxu0 %v3399_v6 }
  0x5e   :  { %1721 = vmatmul.mubr.bf16.vlgmr.msra.gmra.mxu1 %v3401_v7  ;;  %1730 = vmatpush1.bf16.msra.mxu0 %v2948_v8  ;;  %v3032_v8 = vld [vmem:[#allocation2 + $0x520] ss:$16 sps:$4 sm:$0xff]  }
  0x5f   :  { %1771 = vmatpush1.bf16.msra.mxu1 %v2951_v9  ;;  %1731 = vmatprep.subr.bf16.mxu0 %v2956_v10  ;;  %v3035_v9 = vld [vmem:[#allocation2 + $0x720] ss:$16 sps:$4 sm:$0xff]   ;;  %v3040_v10 = vld [vmem:[#allocation2 + $0x504] ss:$16 sps:$4 sm:$0xff]  }
  0x60   :  { %1772 = vmatprep.subr.bf16.mxu1 %v2959_v11  ;;  %1761 = vmatprep.mubr.bf16.mxu0 %v3417_v36  ;;  %v3043_v11 = vld [vmem:[#allocation2 + $0x704] ss:$16 sps:$4 sm:$0xff]  }
  0x61   :  { %1802 = vmatprep.mubr.bf16.mxu1 %v3421_v37 }
  0x62   :  { %1732 = vmatpush1.bf16.msra.mxu0 %v2954_v12  ;;  %v3038_v12 = vld [vmem:[#allocation2 + $0x500] ss:$16 sps:$4 sm:$0xff]  }
  0x63   :  { %1773 = vmatpush1.bf16.msra.mxu1 %v2957_v13  ;;  %1733 = vmatprep.subr.bf16.mxu0 %v2962_v14  ;;  %v3041_v13 = vld [vmem:[#allocation2 + $0x700] ss:$16 sps:$4 sm:$0xff]   ;;  %v3050_v14 = vld [vmem:[#allocation2 + $0xec] ss:$16 sps:$4 sm:$0xff]  }
  0x64   :  { %1774 = vmatprep.subr.bf16.mxu1 %v2965_v15  ;;  %v3053_v15 = vld [vmem:[#allocation2 + $0x2ec] ss:$16 sps:$4 sm:$0xff]  }
  0x66   :  { %1734 = vmatpush1.bf16.msra.mxu0 %v2960_v16  ;;  %v3427_v16 = vcombine.low %v3408_v32, %v3408_v32  ;;  %v3074_v32 = vld [vmem:[#allocation2 + $0x6c] ss:$16 sps:$4 sm:$0xff]  }
  0x67   :  { %1775 = vmatpush1.bf16.msra.mxu1 %v2963_v17  ;;  %1735 = vmatprep.subr.bf16.mxu0 %v2968_v18  ;;  %v3431_v17 = vcombine.low %v3413_v33, %v3413_v33  ;;  %v3048_v18 = vld [vmem:[#allocation2 + $0xe8] ss:$16 sps:$4 sm:$0xff]   ;;  %v3077_v33 = vld [vmem:[#allocation2 + $0x26c] ss:$16 sps:$4 sm:$0xff]  }
  0x68   :  { %1776 = vmatprep.subr.bf16.mxu1 %v2971_v19  ;;  %v3051_v19 = vld [vmem:[#allocation2 + $0x2e8] ss:$16 sps:$4 sm:$0xff]  }
  0x6a   :  { %1736 = vmatpush1.bf16.msra.mxu0 %v2966_v20  ;;  %v3056_v20 = vld [vmem:[#allocation2 + $0xcc] ss:$16 sps:$4 sm:$0xff]  }
  0x6b   :  { %1777 = vmatpush1.bf16.msra.mxu1 %v2969_v21  ;;  %1737 = vmatprep.subr.bf16.mxu0 %v2974_v22  ;;  %v3059_v21 = vld [vmem:[#allocation2 + $0x2cc] ss:$16 sps:$4 sm:$0xff]   ;;  %v3054_v22 = vld [vmem:[#allocation2 + $0xc8] ss:$16 sps:$4 sm:$0xff]  }
  0x6c   :  { %1778 = vmatprep.subr.bf16.mxu1 %v2977_v23  ;;  %v3057_v23 = vld [vmem:[#allocation2 + $0x2c8] ss:$16 sps:$4 sm:$0xff]  }
  0x6e   :  { %1738 = vmatpush1.bf16.msra.mxu0 %v2972_v24  ;;  %v3062_v24 = vld [vmem:[#allocation2 + $0xac] ss:$16 sps:$4 sm:$0xff]  }
  0x6f   :  { %1779 = vmatpush1.bf16.msra.mxu1 %v2975_v25  ;;  %1739 = vmatprep.subr.bf16.mxu0 %v2980_v26  ;;  %v3065_v25 = vld [vmem:[#allocation2 + $0x2ac] ss:$16 sps:$4 sm:$0xff]   ;;  %v3060_v26 = vld [vmem:[#allocation2 + $0xa8] ss:$16 sps:$4 sm:$0xff]  }
  0x70   :  { %1780 = vmatprep.subr.bf16.mxu1 %v2983_v27  ;;  %v3063_v27 = vld [vmem:[#allocation2 + $0x2a8] ss:$16 sps:$4 sm:$0xff]  }
  0x72   :  { %1740 = vmatpush1.bf16.msra.mxu0 %v2978_v28  ;;  %v3068_v28 = vld [vmem:[#allocation2 + $0x8c] ss:$16 sps:$4 sm:$0xff]  }
  0x73   :  { %1781 = vmatpush1.bf16.msra.mxu1 %v2981_v29  ;;  %1741 = vmatprep.subr.bf16.mxu0 %v2986_v30  ;;  %v3071_v29 = vld [vmem:[#allocation2 + $0x28c] ss:$16 sps:$4 sm:$0xff]   ;;  %v3066_v30 = vld [vmem:[#allocation2 + $0x88] ss:$16 sps:$4 sm:$0xff]  }
  0x74   :  { %1782 = vmatprep.subr.bf16.mxu1 %v2989_v31  ;;  %v3069_v31 = vld [vmem:[#allocation2 + $0x288] ss:$16 sps:$4 sm:$0xff]  }
  0x76   :  { %1742 = vmatpush1.bf16.msra.mxu0 %v2984_v34  ;;  %v3072_v34 = vld [vmem:[#allocation2 + $0x68] ss:$16 sps:$4 sm:$0xff]  }
  0x77   :  { %1783 = vmatpush1.bf16.msra.mxu1 %v2987_v35  ;;  %1743 = vmatprep.subr.bf16.mxu0 %v2992_v38  ;;  %v3083_v35 = vld [vmem:[#allocation2 + $0x24c] ss:$16 sps:$4 sm:$0xff]   ;;  %v3078_v38 = vld [vmem:[#allocation2 + $0x48] ss:$16 sps:$4 sm:$0xff]  }
  0x78   :  { %1784 = vmatprep.subr.bf16.mxu1 %v2995_v39  ;;  %v3081_v39 = vld [vmem:[#allocation2 + $0x248] ss:$16 sps:$4 sm:$0xff]  }
  0x7a   :  { %1744 = vmatpush1.bf16.msra.mxu0 %v2990_v40  ;;  %v3086_v40 = vld [vmem:[#allocation2 + $0x2c] ss:$16 sps:$4 sm:$0xff]  }
  0x7b   :  { %1785 = vmatpush1.bf16.msra.mxu1 %v2993_v41  ;;  %1745 = vmatprep.subr.bf16.mxu0 %v2998_v42  ;;  %v3089_v41 = vld [vmem:[#allocation2 + $0x22c] ss:$16 sps:$4 sm:$0xff]   ;;  %v3084_v42 = vld [vmem:[#allocation2 + $0x28] ss:$16 sps:$4 sm:$0xff]  }
  0x7c   :  { %1786 = vmatprep.subr.bf16.mxu1 %v3001_v43  ;;  %v3087_v43 = vld [vmem:[#allocation2 + $0x228] ss:$16 sps:$4 sm:$0xff]  }
  0x7e   :  { %1746 = vmatpush2.bf16.msra.mxu0 %v2996_v44  ;;  %v3092_v44 = vld [vmem:[#allocation2 + $0xc] ss:$16 sps:$4 sm:$0xff]  }
  0x7f   :  { %1787 = vmatpush2.bf16.msra.mxu1 %v2999_v45  ;;  %1747 = vmatprep.subr.bf16.mxu0 %v3004_v46  ;;  %v3095_v45 = vld [vmem:[#allocation2 + $0x20c] ss:$16 sps:$4 sm:$0xff]   ;;  %v3090_v46 = vld [vmem:[#allocation2 + $0x8] ss:$16 sps:$4 sm:$0xff]  }
  0x80   :  { %1788 = vmatprep.subr.bf16.mxu1 %v3007_v48  ;;  %v3093_v48 = vld [vmem:[#allocation2 + $0x208] ss:$16 sps:$4 sm:$0xff]  }
  0x82   :  { %1748 = vmatpush2.bf16.msra.mxu0 %v3002_v49  ;;  %v3098_v49 = vld [vmem:[#allocation2 + $0x1ec] ss:$16 sps:$4 sm:$0xff]  }
  0x83   :  { %1789 = vmatpush2.bf16.msra.mxu1 %v3005_v50  ;;  %1749 = vmatprep.subr.bf16.mxu0 %v3010_v52  ;;  %v3101_v50 = vld [vmem:[#allocation2 + $0x3ec] ss:$16 sps:$4 sm:$0xff]   ;;  %v3096_v52 = vld [vmem:[#allocation2 + $0x1e8] ss:$16 sps:$4 sm:$0xff]  }
  0x84   :  { %1790 = vmatprep.subr.bf16.mxu1 %v3013_v53  ;;  %v3099_v53 = vld [vmem:[#allocation2 + $0x3e8] ss:$16 sps:$4 sm:$0xff]  }
  0x86   :  { %1750 = vmatpush2.bf16.msra.mxu0 %v3008_v54  ;;  %v3104_v54 = vld [vmem:[#allocation2 + $0x1cc] ss:$16 sps:$4 sm:$0xff]  }
  0x87   :  { %1791 = vmatpush2.bf16.msra.mxu1 %v3011_v55  ;;  %1751 = vmatprep.subr.bf16.mxu0 %v3016_v56  ;;  %v3107_v55 = vld [vmem:[#allocation2 + $0x3cc] ss:$16 sps:$4 sm:$0xff]   ;;  %v3102_v56 = vld [vmem:[#allocation2 + $0x1c8] ss:$16 sps:$4 sm:$0xff]  }
  0x88   :  { %1792 = vmatprep.subr.bf16.mxu1 %v3019_v57  ;;  %v3105_v57 = vld [vmem:[#allocation2 + $0x3c8] ss:$16 sps:$4 sm:$0xff]  }
  0x8a   :  { %1752 = vmatpush2.bf16.msra.mxu0 %v3014_v58  ;;  %v3110_v58 = vld [vmem:[#allocation2 + $0x1ac] ss:$16 sps:$4 sm:$0xff]  }
  0x8b   :  { %1793 = vmatpush2.bf16.msra.mxu1 %v3017_v59  ;;  %1753 = vmatprep.subr.bf16.mxu0 %v3022_v60  ;;  %v3113_v59 = vld [vmem:[#allocation2 + $0x3ac] ss:$16 sps:$4 sm:$0xff]   ;;  %v3108_v60 = vld [vmem:[#allocation2 + $0x1a8] ss:$16 sps:$4 sm:$0xff]  }
  0x8c   :  { %1794 = vmatprep.subr.bf16.mxu1 %v3025_v61  ;;  %v3111_v61 = vld [vmem:[#allocation2 + $0x3a8] ss:$16 sps:$4 sm:$0xff]  }
  0x8e   :  { %1754 = vmatpush2.bf16.msra.mxu0 %v3020_v62  ;;  %v3116_v62 = vld [vmem:[#allocation2 + $0x18c] ss:$16 sps:$4 sm:$0xff]  }
  0x8f   :  { %1795 = vmatpush2.bf16.msra.mxu1 %v3023_v63  ;;  %1755 = vmatprep.subr.bf16.mxu0 %v3028_v0  ;;  %v3119_v63 = vld [vmem:[#allocation2 + $0x38c] ss:$16 sps:$4 sm:$0xff]   ;;  %v3114_v0 = vld [vmem:[#allocation2 + $0x188] ss:$16 sps:$4 sm:$0xff]  }
  0x90   :  { %1796 = vmatprep.subr.bf16.mxu1 %v3031_v1  ;;  %v3117_v1 = vld [vmem:[#allocation2 + $0x388] ss:$16 sps:$4 sm:$0xff]  }
  0x92   :  { %1756 = vmatpush2.bf16.msra.mxu0 %v3026_v2  ;;  %v3122_v2 = vld [vmem:[#allocation2 + $0x16c] ss:$16 sps:$4 sm:$0xff]  }
  0x93   :  { %1797 = vmatpush2.bf16.msra.mxu1 %v3029_v3  ;;  %1757 = vmatprep.subr.bf16.mxu0 %v3034_v4  ;;  %v3125_v3 = vld [vmem:[#allocation2 + $0x36c] ss:$16 sps:$4 sm:$0xff]   ;;  %v3120_v4 = vld [vmem:[#allocation2 + $0x168] ss:$16 sps:$4 sm:$0xff]  }
  0x94   :  { %1798 = vmatprep.subr.bf16.mxu1 %v3037_v5  ;;  %v3123_v5 = vld [vmem:[#allocation2 + $0x368] ss:$16 sps:$4 sm:$0xff]  }
  0x96   :  { %1758 = vmatpush2.bf16.msra.mxu0 %v3032_v8  ;;  %v3128_v8 = vld [vmem:[#allocation2 + $0x14c] ss:$16 sps:$4 sm:$0xff]  }
  0x97   :  { %1799 = vmatpush2.bf16.msra.mxu1 %v3035_v9  ;;  %1759 = vmatprep.subr.bf16.mxu0 %v3040_v10  ;;  %v3131_v9 = vld [vmem:[#allocation2 + $0x34c] ss:$16 sps:$4 sm:$0xff]   ;;  %v3126_v10 = vld [vmem:[#allocation2 + $0x148] ss:$16 sps:$4 sm:$0xff]  }
  0x98   :  { %1800 = vmatprep.subr.bf16.mxu1 %v3043_v11  ;;  %v3129_v11 = vld [vmem:[#allocation2 + $0x348] ss:$16 sps:$4 sm:$0xff]  }
  0x9a   :  { %1760 = vmatpush2.bf16.msra.mxu0 %v3038_v12  ;;  %v3134_v12 = vld [vmem:[#allocation2 + $0x12c] ss:$16 sps:$4 sm:$0xff]  }
  0x9b   :  { %1801 = vmatpush2.bf16.msra.mxu1 %v3041_v13  ;;  %1811 = vmatprep.subr.bf16.mxu0 %v3050_v14  ;;  %v3137_v13 = vld [vmem:[#allocation2 + $0x32c] ss:$16 sps:$4 sm:$0xff]   ;;  %v3132_v14 = vld [vmem:[#allocation2 + $0x128] ss:$16 sps:$4 sm:$0xff]  }
  0x9c   :  { %1852 = vmatprep.subr.bf16.mxu1 %v3053_v15  ;;  %v3135_v15 = vld [vmem:[#allocation2 + $0x328] ss:$16 sps:$4 sm:$0xff]  }
  0x9d   :  { %1762 = vmatmul.mubr.bf16.vlgmr.msra.gmra.mxu0 %v3427_v16 }
  0x9e   :  { %1803 = vmatmul.mubr.bf16.vlgmr.msra.gmra.mxu1 %v3431_v17  ;;  %1812 = vmatpush1.bf16.msra.mxu0 %v3048_v18  ;;  %v3140_v18 = vld [vmem:[#allocation2 + $0x10c] ss:$16 sps:$4 sm:$0xff]  }
  0x9f   :  { %1853 = vmatpush1.bf16.msra.mxu1 %v3051_v19  ;;  %1813 = vmatprep.subr.bf16.mxu0 %v3056_v20  ;;  %v3143_v19 = vld [vmem:[#allocation2 + $0x30c] ss:$16 sps:$4 sm:$0xff]   ;;  %v3138_v20 = vld [vmem:[#allocation2 + $0x108] ss:$16 sps:$4 sm:$0xff]  }
  0xa0   :  { %1854 = vmatprep.subr.bf16.mxu1 %v3059_v21  ;;  %1843 = vmatprep.mubr.bf16.mxu0 %v3390_v47  ;;  %v3075_v47 = vld [vmem:[#allocation2 + $0x268] ss:$16 sps:$4 sm:$0xff]  }
  0xa1   :  { %1884 = vmatprep.mubr.bf16.mxu1 %v3395_v51  ;;  %v3080_v51 = vld [vmem:[#allocation2 + $0x4c] ss:$16 sps:$4 sm:$0xff]   ;;  %v3141_v21 = vld [vmem:[#allocation2 + $0x308] ss:$16 sps:$4 sm:$0xff]  }
  0xa2   :  { %1814 = vmatpush1.bf16.msra.mxu0 %v3054_v22  ;;  %v3146_v22 = vld [vmem:[#allocation2 + $0x4ec] ss:$16 sps:$4 sm:$0xff]  }
  0xa3   :  { %1855 = vmatpush1.bf16.msra.mxu1 %v3057_v23  ;;  %1815 = vmatprep.subr.bf16.mxu0 %v3062_v24  ;;  %v3149_v23 = vld [vmem:[#allocation2 + $0x6ec] ss:$16 sps:$4 sm:$0xff]   ;;  %v3144_v24 = vld [vmem:[#allocation2 + $0x4e8] ss:$16 sps:$4 sm:$0xff]  }
  0xa4   :  { %1856 = vmatprep.subr.bf16.mxu1 %v3065_v25  ;;  %v3147_v25 = vld [vmem:[#allocation2 + $0x6e8] ss:$16 sps:$4 sm:$0xff]  }
  0xa6   :  { %1816 = vmatpush1.bf16.msra.mxu0 %v3060_v26  ;;  %v3152_v26 = vld [vmem:[#allocation2 + $0x4cc] ss:$16 sps:$4 sm:$0xff]  }
  0xa7   :  { %1857 = vmatpush1.bf16.msra.mxu1 %v3063_v27  ;;  %1817 = vmatprep.subr.bf16.mxu0 %v3068_v28  ;;  %v3155_v27 = vld [vmem:[#allocation2 + $0x6cc] ss:$16 sps:$4 sm:$0xff]   ;;  %v3150_v28 = vld [vmem:[#allocation2 + $0x4c8] ss:$16 sps:$4 sm:$0xff]  }
  0xa8   :  { %1858 = vmatprep.subr.bf16.mxu1 %v3071_v29  ;;  %v3153_v29 = vld [vmem:[#allocation2 + $0x6c8] ss:$16 sps:$4 sm:$0xff]  }
  0xaa   :  { %1818 = vmatpush1.bf16.msra.mxu0 %v3066_v30  ;;  %v3158_v30 = vld [vmem:[#allocation2 + $0x4ac] ss:$16 sps:$4 sm:$0xff]  }
  0xab   :  { %1859 = vmatpush1.bf16.msra.mxu1 %v3069_v31  ;;  %1819 = vmatprep.subr.bf16.mxu0 %v3074_v32  ;;  %v3161_v31 = vld [vmem:[#allocation2 + $0x6ac] ss:$16 sps:$4 sm:$0xff]   ;;  %v3156_v32 = vld [vmem:[#allocation2 + $0x4a8] ss:$16 sps:$4 sm:$0xff]  }
  0xac   :  { %1860 = vmatprep.subr.bf16.mxu1 %v3077_v33  ;;  %v3159_v33 = vld [vmem:[#allocation2 + $0x6a8] ss:$16 sps:$4 sm:$0xff]  }
  0xae   :  { %1820 = vmatpush1.bf16.msra.mxu0 %v3072_v34  ;;  %v3164_v34 = vld [vmem:[#allocation2 + $0x48c] ss:$16 sps:$4 sm:$0xff]  }
  0xaf   :  { %1861 = vmatpush1.bf16.msra.mxu1 %v3075_v47  ;;  %1821 = vmatprep.subr.bf16.mxu0 %v3080_v51  ;;  %v3165_v47 = vld [vmem:[#allocation2 + $0x688] ss:$16 sps:$4 sm:$0xff]   ;;  %v3170_v51 = vld [vmem:[#allocation2 + $0x46c] ss:$16 sps:$4 sm:$0xff]  }
  0xb0   :  { %1862 = vmatprep.subr.bf16.mxu1 %v3083_v35  ;;  %v3173_v35 = vld [vmem:[#allocation2 + $0x66c] ss:$16 sps:$4 sm:$0xff]  }
  0xb2   :  { %1822 = vmatpush1.bf16.msra.mxu0 %v3078_v38  ;;  %v3168_v38 = vld [vmem:[#allocation2 + $0x468] ss:$16 sps:$4 sm:$0xff]  }
  0xb3   :  { %1863 = vmatpush1.bf16.msra.mxu1 %v3081_v39  ;;  %1823 = vmatprep.subr.bf16.mxu0 %v3086_v40  ;;  %v3179_v39 = vld [vmem:[#allocation2 + $0x64c] ss:$16 sps:$4 sm:$0xff]   ;;  %v3174_v40 = vld [vmem:[#allocation2 + $0x448] ss:$16 sps:$4 sm:$0xff]  }
  0xb4   :  { %1864 = vmatprep.subr.bf16.mxu1 %v3089_v41  ;;  %v3177_v41 = vld [vmem:[#allocation2 + $0x648] ss:$16 sps:$4 sm:$0xff]  }
  0xb6   :  { %1824 = vmatpush1.bf16.msra.mxu0 %v3084_v42  ;;  %v3182_v42 = vld [vmem:[#allocation2 + $0x42c] ss:$16 sps:$4 sm:$0xff]  }
  0xb7   :  { %1865 = vmatpush1.bf16.msra.mxu1 %v3087_v43  ;;  %1825 = vmatprep.subr.bf16.mxu0 %v3092_v44  ;;  %v3185_v43 = vld [vmem:[#allocation2 + $0x62c] ss:$16 sps:$4 sm:$0xff]   ;;  %v3180_v44 = vld [vmem:[#allocation2 + $0x428] ss:$16 sps:$4 sm:$0xff]  }
  0xb8   :  { %1866 = vmatprep.subr.bf16.mxu1 %v3095_v45  ;;  %v3183_v45 = vld [vmem:[#allocation2 + $0x628] ss:$16 sps:$4 sm:$0xff]  }
  0xba   :  { %1826 = vmatpush1.bf16.msra.mxu0 %v3090_v46  ;;  %v3188_v46 = vld [vmem:[#allocation2 + $0x40c] ss:$16 sps:$4 sm:$0xff]  }
  0xbb   :  { %1867 = vmatpush1.bf16.msra.mxu1 %v3093_v48  ;;  %1827 = vmatprep.subr.bf16.mxu0 %v3098_v49  ;;  %v3191_v48 = vld [vmem:[#allocation2 + $0x60c] ss:$16 sps:$4 sm:$0xff]   ;;  %v3186_v49 = vld [vmem:[#allocation2 + $0x408] ss:$16 sps:$4 sm:$0xff]  }
  0xbc   :  { %1868 = vmatprep.subr.bf16.mxu1 %v3101_v50  ;;  %v3189_v50 = vld [vmem:[#allocation2 + $0x608] ss:$16 sps:$4 sm:$0xff]  }
  0xbe   :  { %1828 = vmatpush2.bf16.msra.mxu0 %v3096_v52  ;;  %v3194_v52 = vld [vmem:[#allocation2 + $0x5ec] ss:$16 sps:$4 sm:$0xff]  }
  0xbf   :  { %1869 = vmatpush2.bf16.msra.mxu1 %v3099_v53  ;;  %1829 = vmatprep.subr.bf16.mxu0 %v3104_v54  ;;  %v3197_v53 = vld [vmem:[#allocation2 + $0x7ec] ss:$16 sps:$4 sm:$0xff]   ;;  %v3192_v54 = vld [vmem:[#allocation2 + $0x5e8] ss:$16 sps:$4 sm:$0xff]  }
  0xc0   :  { %1870 = vmatprep.subr.bf16.mxu1 %v3107_v55  ;;  %v3195_v55 = vld [vmem:[#allocation2 + $0x7e8] ss:$16 sps:$4 sm:$0xff]  }
  0xc2   :  { %1830 = vmatpush2.bf16.msra.mxu0 %v3102_v56  ;;  %v3200_v56 = vld [vmem:[#allocation2 + $0x5cc] ss:$16 sps:$4 sm:$0xff]  }
  0xc3   :  { %1871 = vmatpush2.bf16.msra.mxu1 %v3105_v57  ;;  %1831 = vmatprep.subr.bf16.mxu0 %v3110_v58  ;;  %v3203_v57 = vld [vmem:[#allocation2 + $0x7cc] ss:$16 sps:$4 sm:$0xff]   ;;  %v3198_v58 = vld [vmem:[#allocation2 + $0x5c8] ss:$16 sps:$4 sm:$0xff]  }
  0xc4   :  { %1872 = vmatprep.subr.bf16.mxu1 %v3113_v59  ;;  %v3201_v59 = vld [vmem:[#allocation2 + $0x7c8] ss:$16 sps:$4 sm:$0xff]  }
  0xc6   :  { %1832 = vmatpush2.bf16.msra.mxu0 %v3108_v60  ;;  %v3206_v60 = vld [vmem:[#allocation2 + $0x5ac] ss:$16 sps:$4 sm:$0xff]  }
  0xc7   :  { %1873 = vmatpush2.bf16.msra.mxu1 %v3111_v61  ;;  %1833 = vmatprep.subr.bf16.mxu0 %v3116_v62  ;;  %v3209_v61 = vld [vmem:[#allocation2 + $0x7ac] ss:$16 sps:$4 sm:$0xff]   ;;  %v3204_v62 = vld [vmem:[#allocation2 + $0x5a8] ss:$16 sps:$4 sm:$0xff]  }
  0xc8   :  { %1874 = vmatprep.subr.bf16.mxu1 %v3119_v63  ;;  %v3207_v63 = vld [vmem:[#allocation2 + $0x7a8] ss:$16 sps:$4 sm:$0xff]  }
  0xca   :  { %1834 = vmatpush2.bf16.msra.mxu0 %v3114_v0  ;;  %v3212_v0 = vld [vmem:[#allocation2 + $0x58c] ss:$16 sps:$4 sm:$0xff]  }
  0xcb   :  { %1875 = vmatpush2.bf16.msra.mxu1 %v3117_v1  ;;  %1835 = vmatprep.subr.bf16.mxu0 %v3122_v2  ;;  %v3215_v1 = vld [vmem:[#allocation2 + $0x78c] ss:$16 sps:$4 sm:$0xff]   ;;  %v3210_v2 = vld [vmem:[#allocation2 + $0x588] ss:$16 sps:$4 sm:$0xff]  }
  0xcc   :  { %1876 = vmatprep.subr.bf16.mxu1 %v3125_v3  ;;  %v3213_v3 = vld [vmem:[#allocation2 + $0x788] ss:$16 sps:$4 sm:$0xff]  }
  0xce   :  { %1836 = vmatpush2.bf16.msra.mxu0 %v3120_v4  ;;  %v3218_v4 = vld [vmem:[#allocation2 + $0x56c] ss:$16 sps:$4 sm:$0xff]  }
  0xcf   :  { %1877 = vmatpush2.bf16.msra.mxu1 %v3123_v5  ;;  %1837 = vmatprep.subr.bf16.mxu0 %v3128_v8  ;;  %v3221_v5 = vld [vmem:[#allocation2 + $0x76c] ss:$16 sps:$4 sm:$0xff]   ;;  %v3216_v8 = vld [vmem:[#allocation2 + $0x568] ss:$16 sps:$4 sm:$0xff]  }
  0xd0   :  { %1878 = vmatprep.subr.bf16.mxu1 %v3131_v9  ;;  %v3219_v9 = vld [vmem:[#allocation2 + $0x768] ss:$16 sps:$4 sm:$0xff]  }
  0xd2   :  { %1838 = vmatpush2.bf16.msra.mxu0 %v3126_v10  ;;  %v3224_v10 = vld [vmem:[#allocation2 + $0x54c] ss:$16 sps:$4 sm:$0xff]  }
  0xd3   :  { %1879 = vmatpush2.bf16.msra.mxu1 %v3129_v11  ;;  %1839 = vmatprep.subr.bf16.mxu0 %v3134_v12  ;;  %v3227_v11 = vld [vmem:[#allocation2 + $0x74c] ss:$16 sps:$4 sm:$0xff]   ;;  %v3222_v12 = vld [vmem:[#allocation2 + $0x548] ss:$16 sps:$4 sm:$0xff]  }
  0xd4   :  { %1880 = vmatprep.subr.bf16.mxu1 %v3137_v13  ;;  %v3225_v13 = vld [vmem:[#allocation2 + $0x748] ss:$16 sps:$4 sm:$0xff]  }
  0xd6   :  { %1840 = vmatpush2.bf16.msra.mxu0 %v3132_v14  ;;  %v3230_v14 = vld [vmem:[#allocation2 + $0x52c] ss:$16 sps:$4 sm:$0xff]  }
  0xd7   :  { %1881 = vmatpush2.bf16.msra.mxu1 %v3135_v15  ;;  %1841 = vmatprep.subr.bf16.mxu0 %v3140_v18  ;;  %v3233_v15 = vld [vmem:[#allocation2 + $0x72c] ss:$16 sps:$4 sm:$0xff]   ;;  %v3228_v18 = vld [vmem:[#allocation2 + $0x528] ss:$16 sps:$4 sm:$0xff]  }
  0xd8   :  { %1882 = vmatprep.subr.bf16.mxu1 %v3143_v19  ;;  %v3231_v19 = vld [vmem:[#allocation2 + $0x728] ss:$16 sps:$4 sm:$0xff]  }
  0xda   :  { %1842 = vmatpush2.bf16.msra.mxu0 %v3138_v20  ;;  %v3236_v20 = vld [vmem:[#allocation2 + $0x50c] ss:$16 sps:$4 sm:$0xff]  }
  0xdb   :  { %1883 = vmatpush2.bf16.msra.mxu1 %v3141_v21  ;;  %1893 = vmatprep.subr.bf16.mxu0 %v3146_v22  ;;  %v3239_v21 = vld [vmem:[#allocation2 + $0x70c] ss:$16 sps:$4 sm:$0xff]   ;;  %v3234_v22 = vld [vmem:[#allocation2 + $0x508] ss:$16 sps:$4 sm:$0xff]  }
  0xdc   :  { %1934 = vmatprep.subr.bf16.mxu1 %v3149_v23  ;;  %v3237_v23 = vld [vmem:[#allocation2 + $0x708] ss:$16 sps:$4 sm:$0xff]  }
  0xdd   :  { %1844 = vmatmul.mubr.bf16.vlgmr.msra.gmra.mxu0 %v3399_v6  ;;  %v3167_v6 = vld [vmem:[#allocation2 + $0x68c] ss:$16 sps:$4 sm:$0xff]  }
  0xde   :  { %1885 = vmatmul.mubr.bf16.vlgmr.msra.gmra.mxu1 %v3401_v7  ;;  %1894 = vmatpush1.bf16.msra.mxu0 %v3144_v24  ;;  %v3162_v7 = vld [vmem:[#allocation2 + $0x488] ss:$16 sps:$4 sm:$0xff]  }
  0xdf   :  { %1935 = vmatpush1.bf16.msra.mxu1 %v3147_v25  ;;  %1895 = vmatprep.subr.bf16.mxu0 %v3152_v26  ;;  %v3240_v24 = vld [vmem:[%s3578_s3 + $0x78] sm:$0xff]   ;;  %v3242_v26 = vld [vmem:[%s3578_s3 + $0x70] sm:$0xff]  }
  0xe0   :  { %1936 = vmatprep.subr.bf16.mxu1 %v3155_v27  ;;  %1925 = vmatprep.mubr.bf16.mxu0 %v3417_v36  ;;  %v3171_v36 = vld [vmem:[#allocation2 + $0x668] ss:$16 sps:$4 sm:$0xff]  }
  0xe1   :  { %1966 = vmatprep.mubr.bf16.mxu1 %v3421_v37  ;;  %v3176_v37 = vld [vmem:[#allocation2 + $0x44c] ss:$16 sps:$4 sm:$0xff]  }
  0xe2   :  { %1896 = vmatpush1.bf16.msra.mxu0 %v3150_v28  ;;  %v3241_v25 = vld [vmem:[%s3578_s3 + $0x38] sm:$0xff]  }
  0xe3   :  { %1937 = vmatpush1.bf16.msra.mxu1 %v3153_v29  ;;  %1897 = vmatprep.subr.bf16.mxu0 %v3158_v30  ;;  %v3243_v29 = vld [vmem:[%s3578_s3 + $0x30] sm:$0xff]  }
  0xe4   :  { %1938 = vmatprep.subr.bf16.mxu1 %v3161_v31 }
  0xe6   :  { %1898 = vmatpush1.bf16.msra.mxu0 %v3156_v32  ;;  %v3244_v32 = vld [vmem:[%s3578_s3 + $0x68] sm:$0xff]  }
  0xe7   :  { %1939 = vmatpush1.bf16.msra.mxu1 %v3159_v33  ;;  %1899 = vmatprep.subr.bf16.mxu0 %v3164_v34 }
  0xe8   :  { %1940 = vmatprep.subr.bf16.mxu1 %v3167_v6 }
  0xea   :  { %1900 = vmatpush1.bf16.msra.mxu0 %v3162_v7 }
  0xeb   :  { %1941 = vmatpush1.bf16.msra.mxu1 %v3165_v47  ;;  %1901 = vmatprep.subr.bf16.mxu0 %v3170_v51  ;;  %v3256_v47 = vld [vmem:[%s3578_s3 + $0xf8] sm:$0xff]  }
  0xec   :  { %1942 = vmatprep.subr.bf16.mxu1 %v3173_v35  ;;  %v3257_v51 = vld [vmem:[%s3578_s3 + $0xb8] sm:$0xff]   ;;  %v3258_v35 = vld [vmem:[%s3578_s3 + $0xf0] sm:$0xff]  }
  0xee   :  { %1902 = vmatpush1.bf16.msra.mxu0 %v3168_v38  ;;  %v3247_v38 = vld [vmem:[%s3578_s3 + $0x20] sm:$0xff]  }
  0xef   :  { %1943 = vmatpush1.bf16.msra.mxu1 %v3171_v36  ;;  %1903 = vmatprep.subr.bf16.mxu0 %v3176_v37  ;;  %v3259_v36 = vld [vmem:[%s3578_s3 + $0xb0] sm:$0xff]   ;;  %v3248_v37 = vld [vmem:[%s3578_s3 + $0x58] sm:$0xff]  }
  0xf0   :  { %1944 = vmatprep.subr.bf16.mxu1 %v3179_v39  ;;  %v3260_v39 = vld [vmem:[%s3578_s3 + $0xe8] sm:$0xff]  }
  0xf2   :  { %1904 = vmatpush1.bf16.msra.mxu0 %v3174_v40  ;;  %v3249_v40 = vld [vmem:[%s3578_s3 + $0x18] sm:$0xff]  }
  0xf3   :  { %1945 = vmatpush1.bf16.msra.mxu1 %v3177_v41  ;;  %1905 = vmatprep.subr.bf16.mxu0 %v3182_v42  ;;  %v3261_v41 = vld [vmem:[%s3578_s3 + $0xa8] sm:$0xff]   ;;  %v3250_v42 = vld [vmem:[%s3578_s3 + $0x50] sm:$0xff]  }
  0xf4   :  { %1946 = vmatprep.subr.bf16.mxu1 %v3185_v43  ;;  %v3262_v43 = vld [vmem:[%s3578_s3 + $0xe0] sm:$0xff]  }
  0xf6   :  { %1906 = vmatpush1.bf16.msra.mxu0 %v3180_v44  ;;  %v3251_v44 = vld [vmem:[%s3578_s3 + $0x10] sm:$0xff]  }
  0xf7   :  { %1947 = vmatpush1.bf16.msra.mxu1 %v3183_v45  ;;  %1907 = vmatprep.subr.bf16.mxu0 %v3188_v46  ;;  %v3263_v45 = vld [vmem:[%s3578_s3 + $0xa0] sm:$0xff]   ;;  %v3252_v46 = vld [vmem:[%s3578_s3 + $0x48] sm:$0xff]  }
  0xf8   :  { %1948 = vmatprep.subr.bf16.mxu1 %v3191_v48  ;;  %v3264_v48 = vld [vmem:[%s3578_s3 + $0xd8] sm:$0xff]  }
  0xfa   :  { %1908 = vmatpush1.bf16.msra.mxu0 %v3186_v49  ;;  %v3253_v49 = vld [vmem:[%s3578_s3 + $0x8] sm:$0xff]  }
  0xfb   :  { %1949 = vmatpush1.bf16.msra.mxu1 %v3189_v50  ;;  %1909 = vmatprep.subr.bf16.mxu0 %v3194_v52  ;;  %v3265_v50 = vld [vmem:[%s3578_s3 + $0x98] sm:$0xff]   ;;  %v3254_v52 = vld [vmem:[%s3578_s3 + $0x40] sm:$0xff]  }
  0xfc   :  { %1950 = vmatprep.subr.bf16.mxu1 %v3197_v53  ;;  %v3255_v53 = vld [vmem:[%s3578_s3] sm:$0xff]  }
  0xfe   :  { %1910 = vmatpush2.bf16.msra.mxu0 %v3192_v54  ;;  %v319_v54 = vlaneseq }
  0xff   :  { %1951 = vmatpush2.bf16.msra.mxu1 %v3195_v55  ;;  %1911 = vmatprep.subr.bf16.mxu0 %v3200_v56 }
 0x100   :  { %1952 = vmatprep.subr.bf16.mxu1 %v3203_v57  ;;  %v3527_v55 = vshrl.u32 %v319_v54, 7  ;;  %v3533_v57 = vld [vmem:[%s3577_s2] sm:$0xf] }
 0x102   :  { %1912 = vmatpush2.bf16.msra.mxu0 %v3198_v58  ;;  %v321_v56 = vsub.s32 0, %v3527_v55  ;;  %v325_v58 = vsub.s32 1, %v3527_v55 }
 0x103   :  { %1953 = vmatpush2.bf16.msra.mxu1 %v3201_v59  ;;  %1913 = vmatprep.subr.bf16.mxu0 %v3206_v60 }
 0x104   :  { %1954 = vmatprep.subr.bf16.mxu1 %v3209_v61  ;;  %v322_v59 = vrot.slane %v3533_v57, %v321_v56  ;;  %v326_v60 = vrot.slane %v3533_v57, %v325_v58 }
 0x106   :  { %1914 = vmatpush2.bf16.msra.mxu0 %v3204_v62 }
 0x107   :  { %1955 = vmatpush2.bf16.msra.mxu1 %v3207_v63  ;;  %1915 = vmatprep.subr.bf16.mxu0 %v3212_v0  ;;  %v3266_v63 = vld [vmem:[%s3578_s3 + $0xd0] sm:$0xff]  }
 0x108   :  { %1956 = vmatprep.subr.bf16.mxu1 %v3215_v1  ;;  %v3267_v1 = vld [vmem:[%s3578_s3 + $0x90] sm:$0xff]  }
 0x10a   :  { %1916 = vmatpush2.bf16.msra.mxu0 %v3210_v2 }
 0x10b   :  { %1957 = vmatpush2.bf16.msra.mxu1 %v3213_v3  ;;  %1917 = vmatprep.subr.bf16.mxu0 %v3218_v4 }
 0x10c   :  { %1958 = vmatprep.subr.bf16.mxu1 %v3221_v5 }
 0x10e   :  { %1918 = vmatpush2.bf16.msra.mxu0 %v3216_v8 }
 0x10f   :  { %1959 = vmatpush2.bf16.msra.mxu1 %v3219_v9  ;;  %1919 = vmatprep.subr.bf16.mxu0 %v3224_v10  ;;  %v3268_v10 = vld [vmem:[%s3578_s3 + $0xc8] sm:$0xff]  }
 0x110   :  { %1960 = vmatprep.subr.bf16.mxu1 %v3227_v11 }
 0x112   :  { %1920 = vmatpush2.bf16.msra.mxu0 %v3222_v12 }
 0x113   :  { %1961 = vmatpush2.bf16.msra.mxu1 %v3225_v13  ;;  %1921 = vmatprep.subr.bf16.mxu0 %v3230_v14  ;;  %v3269_v13 = vld [vmem:[%s3578_s3 + $0x88] sm:$0xff]  }
 0x114   :  { %1962 = vmatprep.subr.bf16.mxu1 %v3233_v15 }
 0x116   :  { %1922 = vmatpush2.bf16.msra.mxu0 %v3228_v18 }
 0x117   :  { %1963 = vmatpush2.bf16.msra.mxu1 %v3231_v19  ;;  %1923 = vmatprep.subr.bf16.mxu0 %v3236_v20 }
 0x118   :  { %1964 = vmatprep.subr.bf16.mxu1 %v3239_v21 }
 0x11a   :  { %1924 = vmatpush2.bf16.msra.mxu0 %v3234_v22  ;;  %v3270_v22 = vld [vmem:[%s3578_s3 + $0xc0] sm:$0xff]  }
 0x11b   :  { %1965 = vmatpush2.bf16.msra.mxu1 %v3237_v23  ;;  %2767 = vmatprep.subr.bf16.mxu0 %v3240_v24  ;;  %v3271_v24 = vld [vmem:[%s3578_s3 + $0x80] sm:$0xff]  }
 0x11c   :  { %2789 = vmatprep.subr.bf16.mxu1 %v3256_v47  ;;  %v3275_v47 = vld [vmem:[#allocation4 + $0x20] sm:$0xff]  }
 0x11d   :  { %v3450_v27 = vpop.f32.mrf.mxu0  ;;  %1926 = vmatmul.mubr.bf16.vlgmr.msra.gmra.mxu0 %v3427_v16  ;;  %v3245_v16 = vld [vmem:[%s3578_s3 + $0x28] sm:$0xff]  }
 0x11e   :  { %v3452_v28 = vpop.f32.mrf.mxu1  ;;  %1967 = vmatmul.mubr.bf16.vlgmr.msra.gmra.mxu1 %v3431_v17  ;;  %2768 = vmatpush3.bf16.msra.mxu0 %v3241_v25  ;;  %v3246_v17 = vld [vmem:[%s3578_s3 + $0x60] sm:$0xff]   ;;  %v1682_v61 = vadd.f32 %v3450_v27, %v322_v59 }
 0x11f   :  { %v1683_v30 = vpop.f32.mrf.mxu0  ;;  %2769 = vmatprep.subr.bf16.mxu0 %v3242_v26  ;;  %2790 = vmatpush3.bf16.msra.mxu1 %v3257_v51  ;;  %v3276_v51 = vld [vmem:[#allocation4 + $0x18] sm:$0xff]  }
 0x120   :  { %v3459_v31 = vpop.f32.mrf.mxu1  ;;  %2791 = vmatprep.subr.bf16.mxu1 %v3258_v35  ;;  %v1684_v62 = vadd.f32 %v1683_v30, %v326_v60  ;;  %v1723_v0 = vadd.f32 %v3452_v28, %v1682_v61  ;;  %v329_v35 = vsub.s32 2, %v3527_v55  ;;  %v3277_v61 = vld [vmem:[#allocation4 + $0x10] sm:$0xff]  }
 0x121   :  { %v1685_v33 = vpop.f32.mrf.mxu0 }
 0x122   :  { %v1726_v34 = vpop.f32.mrf.mxu1  ;;  %2770 = vmatpush3.bf16.msra.mxu0 %v3243_v29  ;;  %v1725_v4 = vadd.f32 %v3459_v31, %v1684_v62 }
 0x123   :  { %v1686_v6 = vpop.f32.mrf.mxu0  ;;  %2771 = vmatprep.subr.bf16.mxu0 %v3244_v32  ;;  %2792 = vmatpush3.bf16.msra.mxu1 %v3259_v36  ;;  %v330_v36 = vrot.slane %v3533_v57, %v329_v35 }
 0x124   :  { %v1727_v7 = vpop.f32.mrf.mxu1  ;;  %2793 = vmatprep.subr.bf16.mxu1 %v3260_v39  ;;  %v3273_v6 = vld [vmem:[#allocation4 + $0x30] sm:$0xff]  }
 0x125   :  { %v3274_v7 = vld [vmem:[#allocation4 + $0x28] sm:$0xff]  }
 0x126   :  { %2772 = vmatpush3.bf16.msra.mxu0 %v3245_v16  ;;  %v3272_v16 = vld [vmem:[#allocation4 + $0x38] sm:$0xff]  }
 0x127   :  { %2773 = vmatprep.subr.bf16.mxu0 %v3246_v17  ;;  %2794 = vmatpush3.bf16.msra.mxu1 %v3261_v41  ;;  %v3334_v17 = vmov 0.0  }
 0x128   :  { %2795 = vmatprep.subr.bf16.mxu1 %v3262_v43 }
 0x12a   :  { %2774 = vmatpush3.bf16.msra.mxu0 %v3247_v38  ;;  %v333_v38 = vsub.s32 3, %v3527_v55 }
 0x12b   :  { %2775 = vmatprep.subr.bf16.mxu0 %v3248_v37  ;;  %2796 = vmatpush3.bf16.msra.mxu1 %v3263_v45 }
 0x12c   :  { %2797 = vmatprep.subr.bf16.mxu1 %v3264_v48  ;;  %v334_v37 = vrot.slane %v3533_v57, %v333_v38 }
 0x12e   :  { %2776 = vmatpush3.bf16.msra.mxu0 %v3249_v40 }
 0x12f   :  { %2777 = vmatprep.subr.bf16.mxu0 %v3250_v42  ;;  %2798 = vmatpush3.bf16.msra.mxu1 %v3265_v50 }
 0x130   :  { %2799 = vmatprep.subr.bf16.mxu1 %v3266_v63 }
 0x132   :  { %2778 = vmatpush3.bf16.msra.mxu0 %v3251_v44 }
 0x133   :  { %2779 = vmatprep.subr.bf16.mxu0 %v3252_v46  ;;  %2800 = vmatpush3.bf16.msra.mxu1 %v3267_v1 }
 0x134   :  { %2801 = vmatprep.subr.bf16.mxu1 %v3268_v10 }
 0x136   :  { %2780 = vmatpush3.bf16.msra.mxu0 %v3253_v49 }
 0x137   :  { %2781 = vmatprep.subr.bf16.mxu0 %v3254_v52  ;;  %2802 = vmatpush3.bf16.msra.mxu1 %v3269_v13 }
 0x138   :  { %2803 = vmatprep.subr.bf16.mxu1 %v3270_v22 }
 0x13a   :  { %2782 = vmatpush3.bf16.msra.mxu0 %v3255_v53 }
 0x13b   :  { %2804 = vmatpush3.bf16.msra.mxu1 %v3271_v24  ;;  %2820 = vmatprep.subr.bf16.mxu0 %v3334_v17 }
 0x15d   :  { %v1763_v2 = vpop.f32.mrf.mxu0 }
 0x15e   :  { %v1804_v3 = vpop.f32.mrf.mxu1  ;;  %v1764_v5 = vadd.f32 %v1763_v2, %v1723_v0  ;;  %v3278_v0 = vld [vmem:[#allocation4 + $0x8] sm:$0xff]  }
 0x15f   :  { %v1765_v8 = vpop.f32.mrf.mxu0 }
 0x160   :  { %v1806_v9 = vpop.f32.mrf.mxu1  ;;  %v1805_v11 = vadd.f32 %v1804_v3, %v1764_v5  ;;  %v1766_v12 = vadd.f32 %v1765_v8, %v1725_v4  ;;  %v3279_v4 = vld [vmem:[#allocation4] sm:$0xff]  }
 0x161   :  { %v1767_v14 = vpop.f32.mrf.mxu0  ;;  %v2725_v5 = vld [vmem:[%s3579_s4] ss:$0 sm:$0xff] }
 0x162   :  { %v1808_v15 = vpop.f32.mrf.mxu1  ;;  %v1807_v18 = vadd.f32 %v1806_v9, %v1766_v12  ;;  %v1975_v19 = vmax.f32 %v1805_v11, 0.0 }
 0x163   :  { %v1768_v20 = vpop.f32.mrf.mxu0 }
 0x164   :  { %v1809_v21 = vpop.f32.mrf.mxu1  ;;  %v1976_v23 = vmax.f32 %v1807_v18, 0.0  ;;  %v1979_v26 = vpack.c.bf16 %v1975_v19, %v1975_v19  ;;  %v2758_v19 = vld [vmem:[%s3581_s6] ss:$0 sm:$0xff] }
 0x166   :  { %v1980_v25 = vpack.c.bf16 %v1976_v23, %v1976_v23 }
 0x168   :  { %2278 = vmatprep.mubr.bf16.mxu0 %v1980_v25 }
 0x169   :  { %2279 = vmatmul.mubr.bf16.vlgmr.msra.gmra.mxu0 %v1979_v26 }
 0x16a   :  { %2821 = vmatpush3.bf16.msra.mxu0 %v3272_v16  ;;  %2836 = vmatprep.mubr.msk.bf16.mxu0 %vm3335_vm0, %v3334_v17 }
 0x16b   :  { %2822 = vmatprep.subr.bf16.mxu0 %v3334_v17 }
 0x16e   :  { %2823 = vmatpush3.bf16.msra.mxu0 %v3273_v6 }
 0x16f   :  { %2824 = vmatprep.subr.bf16.mxu0 %v3334_v17 }
 0x172   :  { %2825 = vmatpush3.bf16.msra.mxu0 %v3274_v7 }
 0x173   :  { %2826 = vmatprep.subr.bf16.mxu0 %v3334_v17 }
 0x176   :  { %2827 = vmatpush3.bf16.msra.mxu0 %v3275_v47 }
 0x177   :  { %2828 = vmatprep.subr.bf16.mxu0 %v3334_v17 }
 0x17a   :  { %2829 = vmatpush3.bf16.msra.mxu0 %v3276_v51 }
 0x17b   :  { %2830 = vmatprep.subr.bf16.mxu0 %v3334_v17 }
 0x17e   :  { %2831 = vmatpush3.bf16.msra.mxu0 %v3277_v61 }
 0x17f   :  { %2832 = vmatprep.subr.bf16.mxu0 %v3334_v17 }
 0x182   :  { %2833 = vmatpush3.bf16.msra.mxu0 %v3278_v0 }
 0x183   :  { %2834 = vmatprep.subr.bf16.mxu0 %v3334_v17 }
 0x186   :  { %2835 = vmatpush3.bf16.msra.mxu0 %v3279_v4 }
 0x19d   :  { %v1845_v27 = vpop.f32.mrf.mxu0 }
 0x19e   :  { %v1886_v28 = vpop.f32.mrf.mxu1  ;;  %v1846_v39 = vadd.f32 %v1845_v27, %v330_v36 }
 0x19f   :  { %v1847_v29 = vpop.f32.mrf.mxu0 }
 0x1a0   :  { %v1888_v30 = vpop.f32.mrf.mxu1  ;;  %v1848_v40 = vadd.f32 %v1847_v29, %v334_v37  ;;  %v1887_v41 = vadd.f32 %v1886_v28, %v1846_v39 }
 0x1a1   :  { %v1849_v31 = vpop.f32.mrf.mxu0 }
 0x1a2   :  { %v1890_v32 = vpop.f32.mrf.mxu1  ;;  %v1889_v44 = vadd.f32 %v1888_v30, %v1848_v40 }
 0x1a3   :  { %v1850_v33 = vpop.f32.mrf.mxu0 }
 0x1a4   :  { %v1891_v34 = vpop.f32.mrf.mxu1 }
 0x1dd   :  { %v1927_v42 = vpop.f32.mrf.mxu0 }
 0x1de   :  { %v1968_v43 = vpop.f32.mrf.mxu1  ;;  %v1928_v45 = vadd.f32 %v1927_v42, %v1887_v41 }
 0x1df   :  { %v1929_v46 = vpop.f32.mrf.mxu0 }
 0x1e0   :  { %v1970_v48 = vpop.f32.mrf.mxu1  ;;  %v1969_v49 = vadd.f32 %v1968_v43, %v1928_v45  ;;  %v1930_v50 = vadd.f32 %v1929_v46, %v1889_v44 }
 0x1e1   :  { %v1931_v52 = vpop.f32.mrf.mxu0 }
 0x1e2   :  { %v1972_v53 = vpop.f32.mrf.mxu1  ;;  %v1971_v54 = vadd.f32 %v1970_v48, %v1930_v50  ;;  %v1977_v56 = vmax.f32 %v1969_v49, 0.0 }
 0x1e3   :  { %v1932_v55 = vpop.f32.mrf.mxu0 }
 0x1e4   :  { %v1973_v58 = vpop.f32.mrf.mxu1  ;;  %v1978_v59 = vmax.f32 %v1971_v54, 0.0  ;;  %v1981_v57 = vpack.c.bf16 %v1977_v56, %v1977_v56 }
 0x1e6   :  { %v1982_v60 = vpack.c.bf16 %v1978_v59, %v1978_v59 }
 0x1e8   :  { %2318 = vmatprep.mubr.bf16.mxu1 %v1982_v60 }
 0x1e9   :  { %2319 = vmatmul.mubr.bf16.vlgmr.msra.gmra.mxu1 %v1981_v57 }
 0x229   :  { %v2783_v62 = vpop.f32.mrf.mxu0 }
 0x22b   :  { %v2784_v63 = vpop.f32.mrf.mxu0 }
 0x22c   :  { %v2785_v1 = vadd.f32 %v2784_v63, %v2783_v62 }
 0x22d   :  { %v2786_v2 = vpop.f32.mrf.mxu0 }
 0x22e   :  { %v2281_v10 = vadd.f32 %v2785_v1, %v2725_v5 }
 0x22f   :  { %v2787_v3 = vpop.f32.mrf.mxu0 }
 0x2a9   :  { %v2805_v8 = vpop.f32.mrf.mxu1 }
 0x2ab   :  { %v2806_v9 = vpop.f32.mrf.mxu1 }
 0x2ac   :  { %v2807_v11 = vadd.f32 %v2806_v9, %v2805_v8 }
 0x2ad   :  { %v2808_v12 = vpop.f32.mrf.mxu1 }
 0x2ae   :  { %v2321_v13 = vadd.f32 %v2807_v11, %v2281_v10 }
 0x2af   :  { %v2809_v14 = vpop.f32.mrf.mxu1 }
 0x2b0   :  { %v2326_v15 = vmax.f32 %v2321_v13, 0.0 }
 0x2b2   :  { %v2327_v18 = vpack.c.bf16 %v2326_v15, %v2326_v15 }
 0x2b4   :  { %2837 = vmatmul.mubr.bf16.vlgmr.msra.gmra.mxu0 %v2327_v18 }
 0x374   :  { %v2433_v20 = vpop.f32.mrf.mxu0 }
 0x375   :  { %v2434_v21 = vadd.f32 %v2758_v19, %v2433_v20 }
 0x376   :  { %v2838_v22 = vpop.f32.mrf.mxu0 }
 0x377   :  { %v2439_v23 = vpack.c.bf16 %v2434_v21, %v2434_v21  ;;  %2441 = vmax.xlane.f32.xlu0 %v2434_v21 }
 0x378   :  { %v2436_v24 = vpop.f32.mrf.mxu0 }
 0x379   :  { %2440 = vst [vmem:[%s3583_s8] sm:$0xf] %v2439_v23 }
 0x37a   :  { %v2839_v25 = vpop.f32.mrf.mxu0 }
 0x400   :  { %v2442_v26 = vpop.xlane.xlu0 %2441 }
 0x401   :  { %v2443_v27 = vsub.f32 %v2434_v21, %v2442_v26 }
 0x403   :  { %v2444_v28 = vmul.f32 1.442695, %v2443_v27 }
 0x405   :  { %3280 = vpow2.f32 %v2444_v28 }
 0x412   :  { %v3281_v29 = vpop.eup %3280 }
 0x413   :  { %2446 = vadd.xlane.f32.xlu0 %v3281_v29 }
 0x49c   :  { %v2447_v30 = vpop.xlane.xlu0 %2446 }
 0x49d   :  { %3282 = vrcp.f32 %v2447_v30 }
 0x4aa   :  { %v3283_v31 = vpop.eup %3282 }
 0x4ab   :  { %v2449_v32 = vmul.f32 %v3283_v31, %v3281_v29 }
 0x4ad   :  { %2450 = vst [vmem:[%s3582_s7] sm:$0xff] %v2449_v32 }
 0x4ae   :  { %2459 = vsyncpa [#allocation3], 1 }
 0x4af   :  { %2460 = vsyncpa [#allocation5], 1 }

</bundles_post_ra>
